<compile_context>
chip_gen: v6e
topology: v6e:2x2x1
jax: 0.10.0
libtpu: 0.0.40
codegen_flags: <defaults>
</compile_context>

<pallas_src>
import jax
import jax.numpy as jnp
from jax import lax
from jax.experimental import pallas as pl
from jax.experimental.pallas import tpu as pltpu
from math import sqrt


def transe_kernel(flag_ref,                       # SMEM: (1,) int32 corruption flag
                  h_ids, e_ids, t_ids, n_ids,     # VMEM: (TB, 1) int32 id blocks
                  ent_ref, rel_ref,               # VMEM-resident bf16 tables
                  out_ref):                       # VMEM: (2, TB) f32 (row0=pos, row1=neg)
    tb = h_ids.shape[0]
    n_ent = ent_ref.shape[0]
    n_rel = rel_ref.shape[0]

    ent = ent_ref[...]                            # (n_ent, D) bf16, resident
    rel = rel_ref[...]                            # (n_rel, D) bf16, resident

    ent_lane = lax.broadcasted_iota(jnp.int32, (tb, n_ent), 1)
    rel_lane = lax.broadcasted_iota(jnp.int32, (tb, n_rel), 1)

    h_i = h_ids[...]
    t_i = t_ids[...]
    n_i = n_ids[...]

    # Corruption branch at the id level: corrupt tail -> h + r - neg,
    # corrupt head -> neg + r - t.  (TB,1) int32 select, essentially free
    # (replaces the two full-tile (TB,D) selects of the previous revision).
    corrupt_tail = flag_ref[0] == 1
    neg_l = jnp.where(corrupt_tail, h_i, n_i)
    neg_r = jnp.where(corrupt_tail, n_i, t_i)

    def ent_diff(a, b):
        # (onehot(a) - onehot(b)) @ E == ent[a] - ent[b]; exact because the
        # signed one-hot entries are +-1/0 (bf16-exact) and E is bf16 with
        # f32 accumulation on the MXU (which is otherwise idle in this kernel).
        oh = ((ent_lane == a).astype(ent.dtype) - (ent_lane == b).astype(ent.dtype))
        return jnp.dot(oh, ent, preferred_element_type=jnp.float32)   # (tb, D) f32

    pos_hd = ent_diff(h_i, t_i)        # ent[h] - ent[t]
    neg_hd = ent_diff(neg_l, neg_r)    # ent[neg_l] - ent[neg_r]

    # Relation gather (exact bf16 rows as f32) + nn.Embedding(max_norm=1)
    # renorm of the looked-up rows.  Renorming the gathered copy (not the
    # f32-renormed table) keeps the MXU one-hot gather bit-exact; the extra
    # (TB,D) renorm work is negligible next to the gather matmuls.
    r_oh = (rel_lane == e_ids[...]).astype(rel.dtype)
    r = jnp.dot(r_oh, rel, preferred_element_type=jnp.float32)        # (tb, D) f32
    r_sumsq = jnp.sum(r * r, axis=-1, keepdims=True)
    r = r * jnp.minimum(jnp.float32(1.0), lax.rsqrt(r_sumsq + jnp.float32(1e-12)))

    pos_d = pos_hd + r
    neg_d = neg_hd + r
    pos = jnp.sqrt(jnp.sum(pos_d * pos_d, axis=-1))                   # (tb,)
    neg = jnp.sqrt(jnp.sum(neg_d * neg_d, axis=-1))                   # (tb,)

    # Single lane-dense store of the fused (2, TB) score slab.
    out_ref[...] = jnp.concatenate([pos[None, :], neg[None, :]], axis=0)


_VMEM_TABLE_BUDGET = 40 * 1024 * 1024   # bytes; conservative for v7x (64 MiB/TC)


def transe_forward(flag, h_id, e_id, t_id, neg_id, entity_emb, rel_emb, *, tb=None):
    B = h_id.shape[0]
    n_ent, D = entity_emb.shape
    n_rel = rel_emb.shape[0]

    table_bytes = (entity_emb.size * entity_emb.dtype.itemsize
                   + rel_emb.size * rel_emb.dtype.itemsize)
    if table_bytes > _VMEM_TABLE_BUDGET or n_ent > 4096:
        # TODO(synk): chunked HBM->VMEM DMA-gather fallback for huge tables.
        raise NotImplementedError("TransE Pallas kernel: table-resident fast path only")

    if tb is None:
        # TB multiple of 128, capped at 2048; keep >=2 grid tiles when the
        # batch allows so the "parallel" grid can shard across v7x's two TCs.
        tb = int(min(2048, max(128, pl.next_power_of_2(pl.cdiv(B, 2)))))
    num_tiles = int(pl.cdiv(B, tb))
    B_pad = num_tiles * tb
    pad = B_pad - B

    def prep_ids(x):
        x = x.astype(jnp.int32).reshape(-1, 1)
        return jnp.pad(x, ((0, pad), (0, 0))) if pad else x       # pad with valid id 0

    h_id, e_id, t_id, neg_id = map(prep_ids, (h_id, e_id, t_id, neg_id))
    flag = jnp.asarray(flag, jnp.int32).reshape(1)

    cost = pl.CostEstimate(
        flops=2 * B_pad * D * (2 * n_ent + n_rel) + 12 * B_pad * D,
        transcendentals=3 * B_pad,
        bytes_accessed=int(table_bytes) + 4 * B_pad * 4 + 2 * B_pad * 4,
    )

    grid_spec = pltpu.PrefetchScalarGridSpec(
        num_scalar_prefetch=1,                       # corruption flag -> SMEM
        grid=(num_tiles,),
        in_specs=[
            pl.BlockSpec((tb, 1), lambda i, _f: (i, 0)),        # h ids
            pl.BlockSpec((tb, 1), lambda i, _f: (i, 0)),        # e (relation) ids
            pl.BlockSpec((tb, 1), lambda i, _f: (i, 0)),        # t ids
            pl.BlockSpec((tb, 1), lambda i, _f: (i, 0)),        # neg ids
            pl.BlockSpec((n_ent, D), lambda i, _f: (0, 0)),     # entity table, VMEM-resident
            pl.BlockSpec((n_rel, D), lambda i, _f: (0, 0)),     # relation table, VMEM-resident
        ],
        out_specs=pl.BlockSpec((2, tb), lambda i, _f: (0, i)),
    )

    scores = pl.pallas_call(
        transe_kernel,
        out_shape=jax.ShapeDtypeStruct((2, B_pad), jnp.float32),
        grid_spec=grid_spec,
        compiler_params=pltpu.CompilerParams(
            dimension_semantics=("parallel",),
            # 48 MiB leaves headroom inside v7x's 64 MiB/TC; on v5e/v6e
            # (128 MiB physical) this could be raised for larger tables.
            vmem_limit_bytes=48 * 1024 * 1024),
        cost_estimate=cost,
    )(flag, h_id, e_id, t_id, neg_id, entity_emb, rel_emb)

    return scores[0, :B], scores[1, :B]


class TransEJax:
    def __init__(self, num_rels=16, num_entities=64, emb_dim=128, key=None):
        if key is None:
            key = jax.random.PRNGKey(0)
        k_rel, k_ent = jax.random.split(key)
        bound = 6.0 / sqrt(emb_dim)
        # bf16 table storage (halves resident VMEM); kernel gathers exactly and
        # computes in f32.
        self.rel_emb = jax.random.uniform(
            k_rel, (num_rels, emb_dim), jnp.float32, -bound, bound).astype(jnp.bfloat16)
        self.entity_emb = jax.random.uniform(
            k_ent, (num_entities, emb_dim), jnp.float32, -bound, bound).astype(jnp.bfloat16)

    def forward(self, data, flag):
        h_id, e_id, t_id, neg_id = data
        return transe_forward(flag, h_id, e_id, t_id, neg_id,
                              self.entity_emb, self.rel_emb)


if __name__ == "__main__":
    key = jax.random.PRNGKey(0)
    k_model, k_h, k_e, k_t, k_n, k_flag = jax.random.split(key, 6)

    num_rels, num_entities, emb_dim, batch = 16, 64, 128, 8
    model = TransEJax(num_rels, num_entities, emb_dim, key=k_model)

    h_id = jax.random.randint(k_h, (batch,), 0, num_entities)
    e_id = jax.random.randint(k_e, (batch,), 0, num_rels)
    t_id = jax.random.randint(k_t, (batch,), 0, num_entities)
    neg_id = jax.random.randint(k_n, (batch,), 0, num_entities)

    # deterministic stand-in for `np.random.rand() > 0.5` in the torch forward
    flag = (jax.random.uniform(k_flag, ()) > 0.5).astype(jnp.int32).reshape(1)

    pos_score, neg_score = model.forward((h_id, e_id, t_id, neg_id), flag)
    jax.block_until_ready((pos_score, neg_score))

    # cross-check against pure-JAX reference (same bf16 tables, f32 math)
    h = jnp.take(model.entity_emb, h_id, axis=0).astype(jnp.float32)
    r = jnp.take(model.rel_emb, e_id, axis=0).astype(jnp.float32)
    r = r * jnp.minimum(1.0, lax.rsqrt(jnp.sum(r * r, axis=1, keepdims=True) + 1e-12))
    t = jnp.take(model.entity_emb, t_id, axis=0).astype(jnp.float32)
    n = jnp.take(model.entity_emb, neg_id, axis=0).astype(jnp.float32)
    ref_pos = jnp.linalg.norm(h + r - t, axis=1)
    ref_neg = jnp.where(flag[0] == 1,
                        jnp.linalg.norm(h + r - n, axis=1),
                        jnp.linalg.norm(n + r - t, axis=1))
    assert jnp.allclose(pos_score, ref_pos, atol=1e-4, rtol=1e-5), "pos_score mismatch"
    assert jnp.allclose(neg_score, ref_neg, atol=1e-4, rtol=1e-5), "neg_score mismatch"

    print("KERNEL_OK")
</pallas_src>

<mosaic_0001>
module attributes {stable_mosaic.version = 11 : i64} {
  func.func @transe_kernel(%arg0: i32, %arg1: memref<1xi32, #tpu.memory_space<smem>>, %arg2: memref<128x1xi32, #tpu.memory_space<vmem>>, %arg3: memref<128x1xi32, #tpu.memory_space<vmem>>, %arg4: memref<128x1xi32, #tpu.memory_space<vmem>>, %arg5: memref<128x1xi32, #tpu.memory_space<vmem>>, %arg6: memref<64x128xbf16, #tpu.memory_space<vmem>>, %arg7: memref<16x128xbf16, #tpu.memory_space<vmem>>, %arg8: memref<2x128xf32, #tpu.memory_space<vmem>>) attributes {dimension_semantics = [#tpu.dimension_semantics<parallel>], iteration_bounds = array<i64: 1>, scalar_prefetch = 1 : i64, scratch_operands = 0 : i64, tpu.core_type = #tpu.core_type<tc>, window_params = [{transform_indices = @transform_0, window_bounds = array<i64: 128, 1>}, {transform_indices = @transform_1, window_bounds = array<i64: 128, 1>}, {transform_indices = @transform_2, window_bounds = array<i64: 128, 1>}, {transform_indices = @transform_3, window_bounds = array<i64: 128, 1>}, {pipeline_mode = #tpu.pipeline_mode<synchronous>, transform_indices = @transform_4, window_bounds = array<i64: 64, 128>}, {pipeline_mode = #tpu.pipeline_mode<synchronous>, transform_indices = @transform_5, window_bounds = array<i64: 16, 128>}, {transform_indices = @transform_6, window_bounds = array<i64: 2, 128>}]} {
    %c0 = arith.constant 0 : index
    %c0_0 = arith.constant 0 : index
    %0 = vector.load %arg6[%c0, %c0_0] : memref<64x128xbf16, #tpu.memory_space<vmem>>, vector<64x128xbf16>
    %c0_1 = arith.constant 0 : index
    %c0_2 = arith.constant 0 : index
    %1 = vector.load %arg7[%c0_1, %c0_2] : memref<16x128xbf16, #tpu.memory_space<vmem>>, vector<16x128xbf16>
    %2 = tpu.iota {dimensions = array<i32: 1>} : vector<128x64xi32>
    %3 = tpu.iota {dimensions = array<i32: 1>} : vector<128x16xi32>
    %c0_3 = arith.constant 0 : index
    %c0_4 = arith.constant 0 : index
    %4 = vector.load %arg2[%c0_3, %c0_4] : memref<128x1xi32, #tpu.memory_space<vmem>>, vector<128x1xi32>
    %c0_5 = arith.constant 0 : index
    %c0_6 = arith.constant 0 : index
    %5 = vector.load %arg4[%c0_5, %c0_6] : memref<128x1xi32, #tpu.memory_space<vmem>>, vector<128x1xi32>
    %c0_7 = arith.constant 0 : index
    %c0_8 = arith.constant 0 : index
    %6 = vector.load %arg5[%c0_7, %c0_8] : memref<128x1xi32, #tpu.memory_space<vmem>>, vector<128x1xi32>
    %c0_9 = arith.constant 0 : index
    %7 = memref.load %arg1[%c0_9] : memref<1xi32, #tpu.memory_space<smem>>
    %c1_i32 = arith.constant 1 : i32
    %8 = arith.cmpi eq, %7, %c1_i32 : i32
    %9 = arith.select %8, %4, %6 : vector<128x1xi32>
    %10 = arith.select %8, %6, %5 : vector<128x1xi32>
    %11 = vector.broadcast %4 : vector<128x1xi32> to vector<128x64xi32>
    %12 = arith.cmpi eq, %2, %11 : vector<128x64xi32>
    %13 = arith.extui %12 : vector<128x64xi1> to vector<128x64xi32>
    %14 = arith.sitofp %13 : vector<128x64xi32> to vector<128x64xf32>
    %15 = arith.truncf %14 : vector<128x64xf32> to vector<128x64xbf16>
    %16 = vector.broadcast %5 : vector<128x1xi32> to vector<128x64xi32>
    %17 = arith.cmpi eq, %2, %16 : vector<128x64xi32>
    %18 = arith.extui %17 : vector<128x64xi1> to vector<128x64xi32>
    %19 = arith.sitofp %18 : vector<128x64xi32> to vector<128x64xf32>
    %20 = arith.truncf %19 : vector<128x64xf32> to vector<128x64xbf16>
    %21 = arith.subf %15, %20 : vector<128x64xbf16>
    %cst = arith.constant dense<0.000000e+00> : vector<128x128xf32>
    %22 = tpu.matmul %21, %0, %cst {dimension_numbers = #tpu.dot_dimension_numbers<[1], [0], [0], [1], [0, 0, 1, 1], [], []>} : vector<128x64xbf16>, vector<64x128xbf16>, vector<128x128xf32> -> vector<128x128xf32>
    %23 = vector.broadcast %9 : vector<128x1xi32> to vector<128x64xi32>
    %24 = arith.cmpi eq, %2, %23 : vector<128x64xi32>
    %25 = arith.extui %24 : vector<128x64xi1> to vector<128x64xi32>
    %26 = arith.sitofp %25 : vector<128x64xi32> to vector<128x64xf32>
    %27 = arith.truncf %26 : vector<128x64xf32> to vector<128x64xbf16>
    %28 = vector.broadcast %10 : vector<128x1xi32> to vector<128x64xi32>
    %29 = arith.cmpi eq, %2, %28 : vector<128x64xi32>
    %30 = arith.extui %29 : vector<128x64xi1> to vector<128x64xi32>
    %31 = arith.sitofp %30 : vector<128x64xi32> to vector<128x64xf32>
    %32 = arith.truncf %31 : vector<128x64xf32> to vector<128x64xbf16>
    %33 = arith.subf %27, %32 : vector<128x64xbf16>
    %cst_10 = arith.constant dense<0.000000e+00> : vector<128x128xf32>
    %34 = tpu.matmul %33, %0, %cst_10 {dimension_numbers = #tpu.dot_dimension_numbers<[1], [0], [0], [1], [0, 0, 1, 1], [], []>} : vector<128x64xbf16>, vector<64x128xbf16>, vector<128x128xf32> -> vector<128x128xf32>
    %c0_11 = arith.constant 0 : index
    %c0_12 = arith.constant 0 : index
    %35 = vector.load %arg3[%c0_11, %c0_12] : memref<128x1xi32, #tpu.memory_space<vmem>>, vector<128x1xi32>
    %36 = vector.broadcast %35 : vector<128x1xi32> to vector<128x16xi32>
    %37 = arith.cmpi eq, %3, %36 : vector<128x16xi32>
    %38 = arith.extui %37 : vector<128x16xi1> to vector<128x16xi32>
    %39 = arith.sitofp %38 : vector<128x16xi32> to vector<128x16xf32>
    %40 = arith.truncf %39 : vector<128x16xf32> to vector<128x16xbf16>
    %cst_13 = arith.constant dense<0.000000e+00> : vector<128x128xf32>
    %41 = tpu.matmul %40, %1, %cst_13 {dimension_numbers = #tpu.dot_dimension_numbers<[1], [0], [0], [1], [0, 0, 1, 1], [], []>} : vector<128x16xbf16>, vector<16x128xbf16>, vector<128x128xf32> -> vector<128x128xf32>
    %42 = arith.mulf %41, %41 : vector<128x128xf32>
    %cst_14 = arith.constant dense<0.000000e+00> : vector<128xf32>
    %43 = vector.multi_reduction <add>, %42, %cst_14 [1] : vector<128x128xf32> to vector<128xf32>
    %44 = vector.shape_cast %43 : vector<128xf32> to vector<128x1xf32>
    %cst_15 = arith.constant 9.99999996E-13 : f32
    %45 = vector.broadcast %cst_15 : f32 to vector<128x1xf32>
    %46 = arith.addf %44, %45 : vector<128x1xf32>
    %47 = math.rsqrt %46 : vector<128x1xf32>
    %cst_16 = arith.constant 1.000000e+00 : f32
    %48 = vector.broadcast %cst_16 : f32 to vector<128x1xf32>
    %49 = arith.minimumf %48, %47 : vector<128x1xf32>
    %50 = vector.broadcast %49 : vector<128x1xf32> to vector<128x128xf32>
    %51 = arith.mulf %41, %50 : vector<128x128xf32>
    %52 = arith.addf %22, %51 : vector<128x128xf32>
    %53 = arith.addf %34, %51 : vector<128x128xf32>
    %54 = arith.mulf %52, %52 : vector<128x128xf32>
    %cst_17 = arith.constant dense<0.000000e+00> : vector<128xf32>
    %55 = vector.multi_reduction <add>, %54, %cst_17 [1] : vector<128x128xf32> to vector<128xf32>
    %56 = math.sqrt %55 : vector<128xf32>
    %57 = arith.mulf %53, %53 : vector<128x128xf32>
    %cst_18 = arith.constant dense<0.000000e+00> : vector<128xf32>
    %58 = vector.multi_reduction <add>, %57, %cst_18 [1] : vector<128x128xf32> to vector<128xf32>
    %59 = math.sqrt %58 : vector<128xf32>
    %60 = vector.shape_cast %56 : vector<128xf32> to vector<1x128xf32>
    %61 = vector.shape_cast %59 : vector<128xf32> to vector<1x128xf32>
    %62 = tpu.concatenate %60, %61 in 0 : vector<1x128xf32>, vector<1x128xf32> -> vector<2x128xf32>
    %c0_19 = arith.constant 0 : index
    %c0_20 = arith.constant 0 : index
    %63 = vector.load %arg8[%c0_19, %c0_20] : memref<2x128xf32, #tpu.memory_space<vmem>>, vector<2x128xf32>
    tpu.vector_store %arg8[%c0_19, %c0_20], %62 {strides = array<i32>} : memref<2x128xf32, #tpu.memory_space<vmem>>, vector<2x128xf32>,
    return
  }
  func.func @transform_0(%arg0: i32, %arg1: memref<1xi32, #tpu.memory_space<smem>>) -> (i32, i32) {
    %c0_i32 = arith.constant 0 : i32
    %c0_i32_0 = arith.constant 0 : i32
    return %arg0, %c0_i32 : i32, i32
  }
  func.func @transform_1(%arg0: i32, %arg1: memref<1xi32, #tpu.memory_space<smem>>) -> (i32, i32) {
    %c0_i32 = arith.constant 0 : i32
    %c0_i32_0 = arith.constant 0 : i32
    return %arg0, %c0_i32 : i32, i32
  }
  func.func @transform_2(%arg0: i32, %arg1: memref<1xi32, #tpu.memory_space<smem>>) -> (i32, i32) {
    %c0_i32 = arith.constant 0 : i32
    %c0_i32_0 = arith.constant 0 : i32
    return %arg0, %c0_i32 : i32, i32
  }
  func.func @transform_3(%arg0: i32, %arg1: memref<1xi32, #tpu.memory_space<smem>>) -> (i32, i32) {
    %c0_i32 = arith.constant 0 : i32
    %c0_i32_0 = arith.constant 0 : i32
    return %arg0, %c0_i32 : i32, i32
  }
  func.func @transform_4(%arg0: i32, %arg1: memref<1xi32, #tpu.memory_space<smem>>) -> (i32, i32) {
    %c0_i32 = arith.constant 0 : i32
    %c0_i32_0 = arith.constant 0 : i32
    %c0_i32_1 = arith.constant 0 : i32
    return %c0_i32, %c0_i32_0 : i32, i32
  }
  func.func @transform_5(%arg0: i32, %arg1: memref<1xi32, #tpu.memory_space<smem>>) -> (i32, i32) {
    %c0_i32 = arith.constant 0 : i32
    %c0_i32_0 = arith.constant 0 : i32
    %c0_i32_1 = arith.constant 0 : i32
    return %c0_i32, %c0_i32_0 : i32, i32
  }
  func.func @transform_6(%arg0: i32, %arg1: memref<1xi32, #tpu.memory_space<smem>>) -> (i32, i32) {
    %c0_i32 = arith.constant 0 : i32
    %c0_i32_0 = arith.constant 0 : i32
    return %c0_i32, %arg0 : i32, i32
  }
}

</mosaic_0001>

<bundles_post_ra>
// kernel: tpu_custom_call.1
= control target key start
LH: loop header
LB: loop body
LE: loop exit
PB: predicated region body
PF: predicated region fallthrough
CT: control target
= control target key end

     0   :  { %v2080_v2 = vmov 0   ;;  %s3322_s0 = inlined_call_operand.<no memory space> [shape: s32[1], index: 0, kind: input, shape index: {}]   ;;  %s3323_s1 = inlined_call_operand.vmem [shape: s32[128,1], index: 1, kind: input, shape index: {}]   ;;  %s3324_s2 = inlined_call_operand.vmem [shape: s32[128,1], index: 2, kind: input, shape index: {}]   ;;  %s3325_s3 = inlined_call_operand.vmem [shape: s32[128,1], index: 3, kind: input, shape index: {}]   ;;  %s3326_s4 = inlined_call_operand.vmem [shape: s32[128,1], index: 4, kind: input, shape index: {}]   ;;  %s3327_s5 = inlined_call_operand.vmem [shape: bf16[64,128], index: 5, kind: input, shape index: {}]   ;;  %s3328_s6 = inlined_call_operand.vmem [shape: bf16[16,128], index: 6, kind: input, shape index: {}]   ;;  %s3329_s7 = inlined_call_operand.hbm [shape: f32[2,128], index: 7, kind: output, shape index: {}]  }
   0x1   :  { %v558_v0 = vld [vmem:[%s3324_s2 + $0x10] sm:$0xff]  ;;  %v556_v1 = vld [vmem:[%s3324_s2] sm:$0xff]  ;;  %1956 = vset.pattern.permute.xlu1 %v2080_v2  ;;  %1955 = vset.pattern.permute.xlu0 %v2080_v2  ;;  %v559_v3 = vld [vmem:[%s3324_s2 + $0x18] sm:$0xff] }
   0x2   :  { %579 = vperm.xlu1 %1956, %v558_v0   ;;  %573 = vperm.xlu0 %1955, %v556_v1   ;;  %v557_v4 = vld [vmem:[%s3324_s2 + $0x8] sm:$0xff]  ;;  %v560_v6 = vld [vmem:[%s3324_s2 + $0x20] sm:$0xff]  ;;  %v563_v9 = vld [vmem:[%s3324_s2 + $0x38] sm:$0xff] }
   0x3   :  { %v561_v5 = vld [vmem:[%s3324_s2 + $0x28] sm:$0xff]  ;;  %v564_v8 = vld [vmem:[%s3324_s2 + $0x40] sm:$0xff]  ;;  %v562_v10 = vld [vmem:[%s3324_s2 + $0x30] sm:$0xff] }
   0x4   :  { %v565_v7 = vld [vmem:[%s3324_s2 + $0x48] sm:$0xff]  ;;  %v1957_v11 = vld [vmem:[%s3328_s6] sm:$0xff]   ;;  %v567_v12 = vld [vmem:[%s3324_s2 + $0x58] sm:$0xff] }
   0x5   :  { %v566_v13 = vld [vmem:[%s3324_s2 + $0x50] sm:$0xff]  ;;  %1884 = vmatprep.subr.bf16.mxu0 %v1957_v11  ;;  %1950 = vmatprep.subr.bf16.mxu1 %v1957_v11  ;;  %v569_v14 = vld [vmem:[%s3324_s2 + $0x68] sm:$0xff]  ;;  %v568_v15 = vld [vmem:[%s3324_s2 + $0x60] sm:$0xff] }
   0x6   :  { %582 = vperm.xlu1 %1956, %v559_v3   ;;  %576 = vperm.xlu0 %1955, %v557_v4  }
   0x7   :  { %1885 = vmatpush3.bf16.msra.mxu0 %v1957_v11  ;;  %1951 = vmatpush3.bf16.msra.mxu1 %v1957_v11 }
   0xa   :  { %588 = vperm.xlu1 %1956, %v561_v5   ;;  %585 = vperm.xlu0 %1955, %v560_v6  }
   0xe   :  { %600 = vperm.xlu1 %1956, %v565_v7   ;;  %597 = vperm.xlu0 %1955, %v564_v8  }
  0x12   :  { %594 = vperm.xlu1 %1956, %v563_v9   ;;  %591 = vperm.xlu0 %1955, %v562_v10  }
  0x16   :  { %606 = vperm.xlu1 %1956, %v567_v12   ;;  %603 = vperm.xlu0 %1955, %v566_v13  }
  0x17   :  { %13 = vsyncpa [#allocation5], 0  ;;  %p88_p0 = scmp.eq.s32.totalorder %s3322_s0, 1  ;;  %v571_v16 = vld [vmem:[%s3324_s2 + $0x78] sm:$0xff]  ;;  %v570_v17 = vld [vmem:[%s3324_s2 + $0x70] sm:$0xff]  ;;  %vm682_vm5 = vcmask 130048  }
  0x18   :  { %v40_v18 = vld [vmem:[%s3323_s1 + $0x8] sm:$0xff]  ;;  %v39_v19 = vld [vmem:[%s3323_s1] sm:$0xff]  ;;  %v2206_v28 = vld [vmem:[%s3327_s5 + $0x18] sm:$0xff]  }
  0x19   :  { %s89_s13 = scalar_select %p88_p0, 1, 0  ;;  %v56_v21 = vld [vmem:[%s3325_s3 + $0x8] sm:$0xff]  ;;  %v55_v22 = vld [vmem:[%s3325_s3] sm:$0xff]  ;;  %1902 = vmatprep.subr.bf16.mxu1 %v2206_v28  ;;  %1926 = vmatprep.subr.bf16.mxu0 %v2206_v28  ;;  %v42_v31 = vld [vmem:[%s3323_s1 + $0x18] sm:$0xff] }
  0x1a   :  { %612 = vperm.xlu1 %1956, %v569_v14   ;;  %609 = vperm.xlu0 %1955, %v568_v15   ;;  %v72_v23 = vld [vmem:[%s3326_s4 + $0x8] sm:$0xff]  ;;  %v71_v25 = vld [vmem:[%s3326_s4] sm:$0xff]  ;;  %v41_v32 = vld [vmem:[%s3323_s1 + $0x10] sm:$0xff]  ;;  %v37_v15 = vlaneseq }
  0x1b   :  { %v90_v20 = vstv %s89_s13  ;;  %v58_v33 = vld [vmem:[%s3325_s3 + $0x18] sm:$0xff]  ;;  %v57_v34 = vld [vmem:[%s3325_s3 + $0x10] sm:$0xff]  ;;  %v44_v41 = vld [vmem:[%s3323_s1 + $0x28] sm:$0xff] }
  0x1c   :  { %vm2192_vm0 = vcmp.eq.s32.totalorder %v90_v20, 1  ;;  %v74_v35 = vld [vmem:[%s3326_s4 + $0x18] sm:$0xff]  ;;  %v73_v36 = vld [vmem:[%s3326_s4 + $0x10] sm:$0xff]  ;;  %v43_v42 = vld [vmem:[%s3323_s1 + $0x20] sm:$0xff] }
  0x1d   :  { %v93_v26 = vsel %vm2192_vm0, %v40_v18, %v72_v23  ;;  %v92_v27 = vsel %vm2192_vm0, %v39_v19, %v71_v25  ;;  %v109_v29 = vsel %vm2192_vm0, %v72_v23, %v56_v21  ;;  %v108_v30 = vsel %vm2192_vm0, %v71_v25, %v55_v22  ;;  %v60_v43 = vld [vmem:[%s3325_s3 + $0x28] sm:$0xff]  ;;  %v59_v44 = vld [vmem:[%s3325_s3 + $0x20] sm:$0xff]  ;;  %v46_v51 = vld [vmem:[%s3323_s1 + $0x38] sm:$0xff] }
  0x1e   :  { %618 = vperm.xlu1 %1956, %v571_v16   ;;  %615 = vperm.xlu0 %1955, %v570_v17   ;;  %v95_v37 = vsel %vm2192_vm0, %v42_v31, %v74_v35  ;;  %v94_v38 = vsel %vm2192_vm0, %v41_v32, %v73_v36  ;;  %v111_v39 = vsel %vm2192_vm0, %v74_v35, %v58_v33  ;;  %v76_v45 = vld [vmem:[%s3326_s4 + $0x28] sm:$0xff]  ;;  %v75_v46 = vld [vmem:[%s3326_s4 + $0x20] sm:$0xff]  ;;  %v45_v52 = vld [vmem:[%s3323_s1 + $0x30] sm:$0xff] }
  0x1f   :  { %v110_v40 = vsel %vm2192_vm0, %v73_v36, %v57_v34  ;;  %v97_v47 = vsel %vm2192_vm0, %v44_v41, %v76_v45  ;;  %v96_v48 = vsel %vm2192_vm0, %v43_v42, %v75_v46  ;;  %v113_v49 = vsel %vm2192_vm0, %v76_v45, %v60_v43  ;;  %v62_v53 = vld [vmem:[%s3325_s3 + $0x38] sm:$0xff]  ;;  %v61_v54 = vld [vmem:[%s3325_s3 + $0x30] sm:$0xff]  ;;  %v48_v61 = vld [vmem:[%s3323_s1 + $0x48] sm:$0xff] }
  0x20   :  { %v112_v50 = vsel %vm2192_vm0, %v75_v46, %v59_v44  ;;  %v78_v55 = vld [vmem:[%s3326_s4 + $0x38] sm:$0xff]  ;;  %v77_v56 = vld [vmem:[%s3326_s4 + $0x30] sm:$0xff]  ;;  %v47_v62 = vld [vmem:[%s3323_s1 + $0x40] sm:$0xff] }
  0x21   :  { %v99_v57 = vsel %vm2192_vm0, %v46_v51, %v78_v55  ;;  %v98_v58 = vsel %vm2192_vm0, %v45_v52, %v77_v56  ;;  %v115_v59 = vsel %vm2192_vm0, %v78_v55, %v62_v53  ;;  %v114_v60 = vsel %vm2192_vm0, %v77_v56, %v61_v54  ;;  %v64_v63 = vld [vmem:[%s3325_s3 + $0x48] sm:$0xff]  ;;  %v63_v0 = vld [vmem:[%s3325_s3 + $0x40] sm:$0xff]  ;;  %v50_v7 = vld [vmem:[%s3323_s1 + $0x58] sm:$0xff] }
  0x22   :  { %128 = vperm.xlu1 %1956, %v40_v18   ;;  %125 = vperm.xlu0 %1955, %v39_v19   ;;  %v80_v1 = vld [vmem:[%s3326_s4 + $0x48] sm:$0xff]  ;;  %v79_v2 = vld [vmem:[%s3326_s4 + $0x40] sm:$0xff]  ;;  %v49_v8 = vld [vmem:[%s3323_s1 + $0x50] sm:$0xff]  ;;  %v2345_v18 = vand.u32 127, %v37_v15 }
  0x23   :  { %v101_v3 = vsel %vm2192_vm0, %v48_v61, %v80_v1  ;;  %v100_v4 = vsel %vm2192_vm0, %v47_v62, %v79_v2  ;;  %v117_v5 = vsel %vm2192_vm0, %v80_v1, %v64_v63  ;;  %v116_v6 = vsel %vm2192_vm0, %v79_v2, %v63_v0  ;;  %v66_v9 = vld [vmem:[%s3325_s3 + $0x58] sm:$0xff]  ;;  %v65_v10 = vld [vmem:[%s3325_s3 + $0x50] sm:$0xff]  ;;  %v84_v36 = vld [vmem:[%s3326_s4 + $0x68] sm:$0xff] }
  0x24   :  { %v82_v11 = vld [vmem:[%s3326_s4 + $0x58] sm:$0xff]  ;;  %v81_v12 = vld [vmem:[%s3326_s4 + $0x50] sm:$0xff]  ;;  %v2402_v55 = vld [vmem:[%s3327_s5 + $0x8] sm:$0xff]  }
  0x25   :  { %v103_v13 = vsel %vm2192_vm0, %v50_v7, %v82_v11  ;;  %v102_v14 = vsel %vm2192_vm0, %v49_v8, %v81_v12  ;;  %v119_v16 = vsel %vm2192_vm0, %v82_v11, %v66_v9  ;;  %v118_v17 = vsel %vm2192_vm0, %v81_v12, %v65_v10  ;;  %v70_v2 = vld [vmem:[%s3325_s3 + $0x78] sm:$0xff] }
  0x26   :  { %232 = vperm.xlu1 %1956, %v56_v21   ;;  %229 = vperm.xlu0 %1955, %v55_v22   ;;  %v52_v21 = vld [vmem:[%s3323_s1 + $0x68] sm:$0xff]  ;;  %v51_v22 = vld [vmem:[%s3323_s1 + $0x60] sm:$0xff] }
  0x2a   :  { %344 = vperm.xlu1 %1956, %v93_v26   ;;  %341 = vperm.xlu0 %1955, %v92_v27   ;;  %v2081_v26 = vmov 0.0  }
  0x2e   :  { %448 = vperm.xlu1 %1956, %v109_v29   ;;  %445 = vperm.xlu0 %1955, %v108_v30   ;;  %v68_v30 = vld [vmem:[%s3325_s3 + $0x68] sm:$0xff] }
  0x32   :  { %134 = vperm.xlu1 %1956, %v42_v31   ;;  %131 = vperm.xlu0 %1955, %v41_v32   ;;  %v67_v31 = vld [vmem:[%s3325_s3 + $0x60] sm:$0xff] }
  0x36   :  { %238 = vperm.xlu1 %1956, %v58_v33   ;;  %235 = vperm.xlu0 %1955, %v57_v34  }
  0x3a   :  { %350 = vperm.xlu1 %1956, %v95_v37   ;;  %347 = vperm.xlu0 %1955, %v94_v38   ;;  %v83_v37 = vld [vmem:[%s3326_s4 + $0x60] sm:$0xff] }
  0x3e   :  { %454 = vperm.xlu1 %1956, %v111_v39   ;;  %451 = vperm.xlu0 %1955, %v110_v40  }
  0x42   :  { %140 = vperm.xlu1 %1956, %v44_v41   ;;  %137 = vperm.xlu0 %1955, %v43_v42   ;;  %v105_v42 = vsel %vm2192_vm0, %v52_v21, %v84_v36 }
  0x46   :  { %244 = vperm.xlu1 %1956, %v60_v43   ;;  %241 = vperm.xlu0 %1955, %v59_v44   ;;  %v104_v43 = vsel %vm2192_vm0, %v51_v22, %v83_v37 }
  0x4a   :  { %356 = vperm.xlu1 %1956, %v97_v47   ;;  %353 = vperm.xlu0 %1955, %v96_v48   ;;  %v2386_v47 = vld [vmem:[%s3327_s5 + $0x10] sm:$0xff]   ;;  %v121_v48 = vsel %vm2192_vm0, %v84_v36, %v68_v30 }
  0x4e   :  { %460 = vperm.xlu1 %1956, %v113_v49   ;;  %457 = vperm.xlu0 %1955, %v112_v50   ;;  %v120_v49 = vsel %vm2192_vm0, %v83_v37, %v67_v31 }
  0x52   :  { %146 = vperm.xlu1 %1956, %v46_v51   ;;  %143 = vperm.xlu0 %1955, %v45_v52  }
  0x56   :  { %250 = vperm.xlu1 %1956, %v62_v53   ;;  %247 = vperm.xlu0 %1955, %v61_v54  }
  0x5a   :  { %362 = vperm.xlu1 %1956, %v99_v57   ;;  %359 = vperm.xlu0 %1955, %v98_v58   ;;  %v54_v58 = vld [vmem:[%s3323_s1 + $0x78] sm:$0xff] }
  0x5e   :  { %466 = vperm.xlu1 %1956, %v115_v59   ;;  %463 = vperm.xlu0 %1955, %v114_v60   ;;  %v53_v59 = vld [vmem:[%s3323_s1 + $0x70] sm:$0xff] }
  0x62   :  { %152 = vperm.xlu1 %1956, %v48_v61   ;;  %149 = vperm.xlu0 %1955, %v47_v62  }
  0x66   :  { %256 = vperm.xlu1 %1956, %v64_v63   ;;  %253 = vperm.xlu0 %1955, %v63_v0   ;;  %v2420_v63 = vld [vmem:[%s3327_s5] sm:$0xff]  }
  0x6a   :  { %368 = vperm.xlu1 %1956, %v101_v3   ;;  %365 = vperm.xlu0 %1955, %v100_v4   ;;  %v69_v3 = vld [vmem:[%s3325_s3 + $0x70] sm:$0xff]  ;;  %s2082_s3 = smov [#allocation4]  }
  0x6e   :  { %472 = vperm.xlu1 %1956, %v117_v5   ;;  %469 = vperm.xlu0 %1955, %v116_v6   ;;  %v86_v5 = vld [vmem:[%s3326_s4 + $0x78] sm:$0xff]  ;;  %v85_v6 = vld [vmem:[%s3326_s4 + $0x70] sm:$0xff]  ;;  %s1734_s4 = sshll.u32 %s2082_s3, 4  ;;  %s1735_s4 = int_to_ptr.vmem [resolvable:$true] %s1734_s4 }
  0x6f   :  { %v107_v11 = vsel %vm2192_vm0, %v54_v58, %v86_v5  ;;  %v106_v12 = vsel %vm2192_vm0, %v53_v59, %v85_v6  ;;  %s2058_s12 = scalar_lea.vmem %s1735_s4, 32  ;;  %p2063_p2 = scmp.lt.s32.totalorder %s1735_s4, %s1735_s4 }
  0x70   :  { %p2059_p1 = scmp.ne.s32.totalorder %s1735_s4, %s2058_s12  ;;  %p2064_p3 = scmp.lt.s32.totalorder %s2058_s12, %s2058_s12 }
  0x72   :  { %158 = vperm.xlu1 %1956, %v50_v7   ;;  %155 = vperm.xlu0 %1955, %v49_v8   ;;  %p2065_p4 = por %p2064_p3, %p2063_p2 }
  0x74   :  { %p2066_p5 = pnand %p2065_p4, %p2059_p1 }
  0x76   :  { %262 = vperm.xlu1 %1956, %v66_v9   ;;  %259 = vperm.xlu0 %1955, %v65_v10  }
  0x7a   :  { %374 = vperm.xlu1 %1956, %v103_v13   ;;  %371 = vperm.xlu0 %1955, %v102_v14  }
  0x7d   :  { %v580_v19 = vpop.permute.xlu1 %579  ;;  %v574_v20 = vpop.permute.xlu0 %573 }
  0x7e   :  { %478 = vperm.xlu1 %1956, %v119_v16   ;;  %475 = vperm.xlu0 %1955, %v118_v17   ;;  %vm622_vm1 = vcmp.eq.s32.totalorder %v2345_v18, %v580_v19  ;;  %vm620_vm2 = vcmp.eq.s32.totalorder %v2345_v18, %v574_v20  ;;  %v123_v20 = vsel %vm2192_vm0, %v86_v5, %v70_v2 }
  0x7f   :  { %v1808_v27 = vsel %vm622_vm1, 1.0, %v2081_v26  ;;  %v1806_v32 = vsel %vm620_vm2, 1.0, %v2081_v26 }
  0x81   :  { %v583_v23 = vpop.permute.xlu1 %582  ;;  %v577_v25 = vpop.permute.xlu0 %576 }
  0x82   :  { %vm623_vm3 = vcmp.eq.s32.totalorder %v2345_v18, %v583_v23  ;;  %vm621_vm4 = vcmp.eq.s32.totalorder %v2345_v18, %v577_v25  ;;  %164 = vperm.xlu1 %1956, %v52_v21   ;;  %161 = vperm.xlu0 %1955, %v51_v22  }
  0x83   :  { %v1809_v29 = vsel %vm623_vm3, 1.0, %v2081_v26  ;;  %v1807_v33 = vsel %vm621_vm4, 1.0, %v2081_v26 }
  0x84   :  { %v669_v34 = vpack.c.bf16 %v1809_v29, %v1808_v27  ;;  %v668_v35 = vpack.c.bf16 %v1807_v33, %v1806_v32 }
  0x85   :  { %v589_v38 = vpop.permute.xlu1 %588  ;;  %v586_v39 = vpop.permute.xlu0 %585 }
  0x86   :  { %vm625_vm6 = vcmp.eq.s32.totalorder %v2345_v18, %v589_v38  ;;  %vm624_vm7 = vcmp.eq.s32.totalorder %v2345_v18, %v586_v39  ;;  %268 = vperm.xlu1 %1956, %v68_v30   ;;  %265 = vperm.xlu0 %1955, %v67_v31  }
  0x87   :  { %v1811_v40 = vsel %vm625_vm6, 1.0, %v2081_v26  ;;  %v1810_v41 = vsel %vm624_vm7, 1.0, %v2081_v26  ;;  %1886 = vmatprep.mubr.msk.bf16.mxu0 %vm682_vm5, %v668_v35 }
  0x88   :  { %v670_v44 = vpack.c.bf16 %v1811_v40, %v1810_v41  ;;  %1887 = vmatmul.mubr.msk.bf16.vlgmr.msra.gmra.mxu0 %vm682_vm5, %v669_v34 }
  0x89   :  { %v601_v45 = vpop.permute.xlu1 %600  ;;  %v598_v46 = vpop.permute.xlu0 %597  ;;  %1927 = vmatpush3.bf16.msra.mxu0 %v2206_v28 }
  0x8a   :  { %vm629_vm8 = vcmp.eq.s32.totalorder %v2345_v18, %v601_v45  ;;  %vm628_vm9 = vcmp.eq.s32.totalorder %v2345_v18, %v598_v46  ;;  %380 = vperm.xlu1 %1956, %v105_v42   ;;  %377 = vperm.xlu0 %1955, %v104_v43  }
  0x8b   :  { %1890 = vmatprep.mubr.msk.bf16.mxu0 %vm682_vm5, %v670_v44  ;;  %v1814_v50 = vsel %vm628_vm9, 1.0, %v2081_v26  ;;  %v1815_v51 = vsel %vm629_vm8, 1.0, %v2081_v26  ;;  %1928 = vmatprep.subr.bf16.mxu0 %v2386_v47 }
  0x8c   :  { %v672_v52 = vpack.c.bf16 %v1815_v51, %v1814_v50 }
  0x8d   :  { %v595_v53 = vpop.permute.xlu1 %594  ;;  %v592_v54 = vpop.permute.xlu0 %591  ;;  %1929 = vmatpush3.bf16.msra.mxu0 %v2386_v47 }
  0x8e   :  { %vm627_vm10 = vcmp.eq.s32.totalorder %v2345_v18, %v595_v53  ;;  %vm626_vm11 = vcmp.eq.s32.totalorder %v2345_v18, %v592_v54  ;;  %484 = vperm.xlu1 %1956, %v121_v48   ;;  %481 = vperm.xlu0 %1955, %v120_v49  }
  0x8f   :  { %v1813_v56 = vsel %vm627_vm10, 1.0, %v2081_v26  ;;  %v1812_v57 = vsel %vm626_vm11, 1.0, %v2081_v26  ;;  %1894 = vmatprep.mubr.msk.bf16.mxu1 %vm682_vm5, %v672_v52  ;;  %1930 = vmatprep.subr.bf16.mxu0 %v2402_v55 }
  0x90   :  { %v671_v60 = vpack.c.bf16 %v1813_v56, %v1812_v57 }
  0x91   :  { %v607_v61 = vpop.permute.xlu1 %606  ;;  %v604_v62 = vpop.permute.xlu0 %603  ;;  %1931 = vmatpush3.bf16.msra.mxu0 %v2402_v55 }
  0x92   :  { %vm631_vm12 = vcmp.eq.s32.totalorder %v2345_v18, %v607_v61  ;;  %vm630_vm13 = vcmp.eq.s32.totalorder %v2345_v18, %v604_v62  ;;  %170 = vperm.xlu1 %1956, %v54_v58   ;;  %167 = vperm.xlu0 %1955, %v53_v59  }
  0x93   :  { %v1817_v0 = vsel %vm631_vm12, 1.0, %v2081_v26  ;;  %v1816_v1 = vsel %vm630_vm13, 1.0, %v2081_v26  ;;  %1891 = vmatmul.mubr.msk.bf16.gmra.mxu0 %vm682_vm5, %v671_v60  ;;  %1932 = vmatprep.subr.bf16.mxu0 %v2420_v63 }
  0x94   :  { %v673_v4 = vpack.c.bf16 %v1817_v0, %v1816_v1 }
  0x95   :  { %v613_v7 = vpop.permute.xlu1 %612  ;;  %v610_v8 = vpop.permute.xlu0 %609  ;;  %1933 = vmatpush3.bf16.msra.mxu0 %v2420_v63 }
  0x96   :  { %vm633_vm14 = vcmp.eq.s32.totalorder %v2345_v18, %v613_v7  ;;  %vm632_vm15 = vcmp.eq.s32.totalorder %v2345_v18, %v610_v8  ;;  %274 = vperm.xlu1 %1956, %v70_v2   ;;  %271 = vperm.xlu0 %1955, %v69_v3  }
  0x97   :  { %v1819_v9 = vsel %vm633_vm14, 1.0, %v2081_v26  ;;  %v1818_v10 = vsel %vm632_vm15, 1.0, %v2081_v26  ;;  %1895 = vmatmul.mubr.msk.bf16.vlgmr.msra.gmra.mxu1 %vm682_vm5, %v673_v4 }
  0x98   :  { %v674_v13 = vpack.c.bf16 %v1819_v9, %v1818_v10  ;;  %1903 = vmatpush3.bf16.msra.mxu1 %v2206_v28  ;;  %v122_v28 = vsel %vm2192_vm0, %v85_v6, %v69_v3 }
  0x99   :  { %v619_v14 = vpop.permute.xlu1 %618  ;;  %v616_v16 = vpop.permute.xlu0 %615  ;;  %1904 = vmatprep.subr.bf16.mxu1 %v2386_v47 }
  0x9a   :  { %vm635_vm1 = vcmp.eq.s32.totalorder %v2345_v18, %v619_v14  ;;  %vm634_vm2 = vcmp.eq.s32.totalorder %v2345_v18, %v616_v16  ;;  %386 = vperm.xlu1 %1956, %v107_v11   ;;  %383 = vperm.xlu0 %1955, %v106_v12  }
  0x9b   :  { %v1821_v17 = vsel %vm635_vm1, 1.0, %v2081_v26  ;;  %v1820_v19 = vsel %vm634_vm2, 1.0, %v2081_v26  ;;  %1898 = vmatprep.mubr.msk.bf16.mxu1 %vm682_vm5, %v674_v13 }
  0x9c   :  { %v675_v21 = vpack.c.bf16 %v1821_v17, %v1820_v19  ;;  %1905 = vmatpush3.bf16.msra.mxu1 %v2386_v47 }
  0x9d   :  { %v129_v22 = vpop.permute.xlu1 %128  ;;  %v126_v23 = vpop.permute.xlu0 %125  ;;  %1906 = vmatprep.subr.bf16.mxu1 %v2402_v55 }
  0x9e   :  { %vm173_vm3 = vcmp.eq.s32.totalorder %v2345_v18, %v129_v22  ;;  %vm172_vm4 = vcmp.eq.s32.totalorder %v2345_v18, %v126_v23  ;;  %490 = vperm.xlu1 %1956, %v123_v20   ;;  %487 = vperm.xlu0 %1955, %v122_v28  }
  0x9f   :  { %1899 = vmatmul.mubr.msk.bf16.gmra.mxu1 %vm682_vm5, %v675_v21  ;;  %v1743_v24 = vsel %vm173_vm3, 1.0, %v2081_v26  ;;  %v1742_v25 = vsel %vm172_vm4, 1.0, %v2081_v26  ;;  %vm940_vm5 = vcmask 523264  }
  0xa0   :  { %1907 = vmatpush3.bf16.msra.mxu1 %v2402_v55  ;;  %v220_v32 = vpack.c.bf16 %v1743_v24, %v1742_v25 }
  0xa1   :  { %v233_v27 = vpop.permute.xlu1 %232  ;;  %v230_v29 = vpop.permute.xlu0 %229  ;;  %1908 = vmatprep.subr.bf16.mxu1 %v2420_v63 }
  0xa2   :  { %vm277_vm0 = vcmp.eq.s32.totalorder %v2345_v18, %v233_v27  ;;  %vm276_vm6 = vcmp.eq.s32.totalorder %v2345_v18, %v230_v29 }
  0xa3   :  { %v1759_v30 = vsel %vm277_vm0, 1.0, %v2081_v26  ;;  %v1758_v31 = vsel %vm276_vm6, 1.0, %v2081_v26 }
  0xa4   :  { %v324_v33 = vpack.c.bf16 %v1759_v30, %v1758_v31  ;;  %1909 = vmatpush3.bf16.msra.mxu1 %v2420_v63 }
  0xa5   :  { %v345_v34 = vpop.permute.xlu1 %344  ;;  %v342_v35 = vpop.permute.xlu0 %341 }
  0xa6   :  { %v332_v36 = vsub.bf16 %v220_v32, %v324_v33  ;;  %vm389_vm7 = vcmp.eq.s32.totalorder %v2345_v18, %v345_v34  ;;  %vm388_vm8 = vcmp.eq.s32.totalorder %v2345_v18, %v342_v35 }
  0xa7   :  { %v1775_v37 = vsel %vm389_vm7, 1.0, %v2081_v26  ;;  %v1774_v38 = vsel %vm388_vm8, 1.0, %v2081_v26 }
  0xa8   :  { %1910 = vmatprep.mubr.msk.bf16.mxu1 %vm940_vm5, %v332_v36  ;;  %v436_v43 = vpack.c.bf16 %v1775_v37, %v1774_v38 }
  0xa9   :  { %v449_v39 = vpop.permute.xlu1 %448  ;;  %v446_v40 = vpop.permute.xlu0 %445 }
  0xaa   :  { %vm493_vm9 = vcmp.eq.s32.totalorder %v2345_v18, %v449_v39  ;;  %vm492_vm10 = vcmp.eq.s32.totalorder %v2345_v18, %v446_v40 }
  0xab   :  { %v1791_v41 = vsel %vm493_vm9, 1.0, %v2081_v26  ;;  %v1790_v42 = vsel %vm492_vm10, 1.0, %v2081_v26 }
  0xac   :  { %v540_v44 = vpack.c.bf16 %v1791_v41, %v1790_v42 }
  0xad   :  { %v135_v45 = vpop.permute.xlu1 %134  ;;  %v132_v46 = vpop.permute.xlu0 %131 }
  0xae   :  { %v548_v47 = vsub.bf16 %v436_v43, %v540_v44  ;;  %vm175_vm11 = vcmp.eq.s32.totalorder %v2345_v18, %v135_v45  ;;  %vm174_vm12 = vcmp.eq.s32.totalorder %v2345_v18, %v132_v46 }
  0xaf   :  { %v1745_v48 = vsel %vm175_vm11, 1.0, %v2081_v26  ;;  %v1744_v49 = vsel %vm174_vm12, 1.0, %v2081_v26 }
  0xb0   :  { %1934 = vmatprep.mubr.msk.bf16.mxu0 %vm940_vm5, %v548_v47  ;;  %v221_v54 = vpack.c.bf16 %v1745_v48, %v1744_v49 }
  0xb1   :  { %v239_v50 = vpop.permute.xlu1 %238  ;;  %v236_v51 = vpop.permute.xlu0 %235 }
  0xb2   :  { %vm279_vm13 = vcmp.eq.s32.totalorder %v2345_v18, %v239_v50  ;;  %vm278_vm14 = vcmp.eq.s32.totalorder %v2345_v18, %v236_v51 }
  0xb3   :  { %v1761_v52 = vsel %vm279_vm13, 1.0, %v2081_v26  ;;  %v1760_v53 = vsel %vm278_vm14, 1.0, %v2081_v26 }
  0xb4   :  { %v325_v55 = vpack.c.bf16 %v1761_v52, %v1760_v53 }
  0xb5   :  { %v351_v56 = vpop.permute.xlu1 %350  ;;  %v348_v57 = vpop.permute.xlu0 %347 }
  0xb6   :  { %v333_v58 = vsub.bf16 %v221_v54, %v325_v55  ;;  %vm391_vm15 = vcmp.eq.s32.totalorder %v2345_v18, %v351_v56  ;;  %vm390_vm1 = vcmp.eq.s32.totalorder %v2345_v18, %v348_v57 }
  0xb7   :  { %v1777_v59 = vsel %vm391_vm15, 1.0, %v2081_v26  ;;  %v1776_v60 = vsel %vm390_vm1, 1.0, %v2081_v26 }
  0xb8   :  { %1911 = vmatmul.mubr.msk.bf16.vlgmr.msra.gmra.mxu1 %vm940_vm5, %v333_v58  ;;  %v437_v1 = vpack.c.bf16 %v1777_v59, %v1776_v60 }
  0xb9   :  { %v455_v61 = vpop.permute.xlu1 %454  ;;  %v452_v62 = vpop.permute.xlu0 %451 }
  0xba   :  { %vm495_vm2 = vcmp.eq.s32.totalorder %v2345_v18, %v455_v61  ;;  %vm494_vm3 = vcmp.eq.s32.totalorder %v2345_v18, %v452_v62 }
  0xbb   :  { %v1793_v63 = vsel %vm495_vm2, 1.0, %v2081_v26  ;;  %v1792_v0 = vsel %vm494_vm3, 1.0, %v2081_v26 }
  0xbc   :  { %v541_v2 = vpack.c.bf16 %v1793_v63, %v1792_v0 }
  0xbd   :  { %v141_v3 = vpop.permute.xlu1 %140  ;;  %v138_v4 = vpop.permute.xlu0 %137 }
  0xbe   :  { %v549_v5 = vsub.bf16 %v437_v1, %v541_v2  ;;  %vm177_vm4 = vcmp.eq.s32.totalorder %v2345_v18, %v141_v3  ;;  %vm176_vm0 = vcmp.eq.s32.totalorder %v2345_v18, %v138_v4 }
  0xbf   :  { %v1747_v6 = vsel %vm177_vm4, 1.0, %v2081_v26  ;;  %v1746_v7 = vsel %vm176_vm0, 1.0, %v2081_v26 }
  0xc0   :  { %1935 = vmatmul.mubr.msk.bf16.vlgmr.msra.gmra.mxu0 %vm940_vm5, %v549_v5  ;;  %v222_v12 = vpack.c.bf16 %v1747_v6, %v1746_v7 }
  0xc1   :  { %v245_v8 = vpop.permute.xlu1 %244  ;;  %v242_v9 = vpop.permute.xlu0 %241 }
  0xc2   :  { %vm281_vm6 = vcmp.eq.s32.totalorder %v2345_v18, %v245_v8  ;;  %vm280_vm7 = vcmp.eq.s32.totalorder %v2345_v18, %v242_v9 }
  0xc3   :  { %v1763_v10 = vsel %vm281_vm6, 1.0, %v2081_v26  ;;  %v1762_v11 = vsel %vm280_vm7, 1.0, %v2081_v26 }
  0xc4   :  { %v326_v13 = vpack.c.bf16 %v1763_v10, %v1762_v11 }
  0xc5   :  { %v357_v14 = vpop.permute.xlu1 %356  ;;  %v354_v16 = vpop.permute.xlu0 %353 }
  0xc6   :  { %v334_v17 = vsub.bf16 %v222_v12, %v326_v13  ;;  %vm393_vm8 = vcmp.eq.s32.totalorder %v2345_v18, %v357_v14  ;;  %vm392_vm9 = vcmp.eq.s32.totalorder %v2345_v18, %v354_v16 }
  0xc7   :  { %v1779_v19 = vsel %vm393_vm8, 1.0, %v2081_v26  ;;  %v1778_v20 = vsel %vm392_vm9, 1.0, %v2081_v26 }
  0xc8   :  { %1914 = vmatprep.mubr.msk.bf16.mxu1 %vm940_vm5, %v334_v17  ;;  %v438_v24 = vpack.c.bf16 %v1779_v19, %v1778_v20 }
  0xc9   :  { %v461_v28 = vpop.permute.xlu1 %460  ;;  %v458_v21 = vpop.permute.xlu0 %457 }
  0xca   :  { %vm497_vm10 = vcmp.eq.s32.totalorder %v2345_v18, %v461_v28  ;;  %vm496_vm11 = vcmp.eq.s32.totalorder %v2345_v18, %v458_v21 }
  0xcb   :  { %v1795_v22 = vsel %vm497_vm10, 1.0, %v2081_v26  ;;  %v1794_v23 = vsel %vm496_vm11, 1.0, %v2081_v26 }
  0xcc   :  { %v542_v25 = vpack.c.bf16 %v1795_v22, %v1794_v23 }
  0xcd   :  { %v147_v27 = vpop.permute.xlu1 %146  ;;  %v144_v29 = vpop.permute.xlu0 %143 }
  0xce   :  { %v550_v30 = vsub.bf16 %v438_v24, %v542_v25  ;;  %vm179_vm12 = vcmp.eq.s32.totalorder %v2345_v18, %v147_v27  ;;  %vm178_vm13 = vcmp.eq.s32.totalorder %v2345_v18, %v144_v29 }
  0xcf   :  { %v1749_v31 = vsel %vm179_vm12, 1.0, %v2081_v26  ;;  %v1748_v32 = vsel %vm178_vm13, 1.0, %v2081_v26 }
  0xd0   :  { %1938 = vmatprep.mubr.msk.bf16.mxu0 %vm940_vm5, %v550_v30  ;;  %v223_v37 = vpack.c.bf16 %v1749_v31, %v1748_v32 }
  0xd1   :  { %v251_v33 = vpop.permute.xlu1 %250  ;;  %v248_v34 = vpop.permute.xlu0 %247 }
  0xd2   :  { %vm283_vm14 = vcmp.eq.s32.totalorder %v2345_v18, %v251_v33  ;;  %vm282_vm15 = vcmp.eq.s32.totalorder %v2345_v18, %v248_v34 }
  0xd3   :  { %v1765_v35 = vsel %vm283_vm14, 1.0, %v2081_v26  ;;  %v1764_v36 = vsel %vm282_vm15, 1.0, %v2081_v26 }
  0xd4   :  { %v327_v38 = vpack.c.bf16 %v1765_v35, %v1764_v36 }
  0xd5   :  { %v363_v39 = vpop.permute.xlu1 %362  ;;  %v360_v40 = vpop.permute.xlu0 %359 }
  0xd6   :  { %v335_v41 = vsub.bf16 %v223_v37, %v327_v38  ;;  %vm395_vm1 = vcmp.eq.s32.totalorder %v2345_v18, %v363_v39  ;;  %vm394_vm2 = vcmp.eq.s32.totalorder %v2345_v18, %v360_v40 }
  0xd7   :  { %v1781_v42 = vsel %vm395_vm1, 1.0, %v2081_v26  ;;  %v1780_v43 = vsel %vm394_vm2, 1.0, %v2081_v26 }
  0xd8   :  { %1915 = vmatmul.mubr.msk.bf16.gmra.mxu1 %vm940_vm5, %v335_v41  ;;  %v439_v48 = vpack.c.bf16 %v1781_v42, %v1780_v43 }
  0xd9   :  { %v467_v44 = vpop.permute.xlu1 %466  ;;  %v464_v45 = vpop.permute.xlu0 %463 }
  0xda   :  { %vm499_vm3 = vcmp.eq.s32.totalorder %v2345_v18, %v467_v44  ;;  %vm498_vm4 = vcmp.eq.s32.totalorder %v2345_v18, %v464_v45 }
  0xdb   :  { %v1797_v46 = vsel %vm499_vm3, 1.0, %v2081_v26  ;;  %v1796_v47 = vsel %vm498_vm4, 1.0, %v2081_v26 }
  0xdc   :  { %v543_v49 = vpack.c.bf16 %v1797_v46, %v1796_v47 }
  0xdd   :  { %v153_v50 = vpop.permute.xlu1 %152  ;;  %v150_v51 = vpop.permute.xlu0 %149 }
  0xde   :  { %v551_v52 = vsub.bf16 %v439_v48, %v543_v49  ;;  %vm181_vm0 = vcmp.eq.s32.totalorder %v2345_v18, %v153_v50  ;;  %vm180_vm6 = vcmp.eq.s32.totalorder %v2345_v18, %v150_v51 }
  0xdf   :  { %v1751_v53 = vsel %vm181_vm0, 1.0, %v2081_v26  ;;  %v1750_v54 = vsel %vm180_vm6, 1.0, %v2081_v26 }
  0xe0   :  { %1939 = vmatmul.mubr.msk.bf16.gmra.mxu0 %vm940_vm5, %v551_v52  ;;  %v224_v59 = vpack.c.bf16 %v1751_v53, %v1750_v54 }
  0xe1   :  { %v257_v55 = vpop.permute.xlu1 %256  ;;  %v254_v56 = vpop.permute.xlu0 %253 }
  0xe2   :  { %vm285_vm7 = vcmp.eq.s32.totalorder %v2345_v18, %v257_v55  ;;  %vm284_vm8 = vcmp.eq.s32.totalorder %v2345_v18, %v254_v56 }
  0xe3   :  { %v1767_v57 = vsel %vm285_vm7, 1.0, %v2081_v26  ;;  %v1766_v58 = vsel %vm284_vm8, 1.0, %v2081_v26 }
  0xe4   :  { %v328_v60 = vpack.c.bf16 %v1767_v57, %v1766_v58 }
  0xe5   :  { %v369_v61 = vpop.permute.xlu1 %368  ;;  %v366_v62 = vpop.permute.xlu0 %365 }
  0xe6   :  { %v336_v63 = vsub.bf16 %v224_v59, %v328_v60  ;;  %vm397_vm9 = vcmp.eq.s32.totalorder %v2345_v18, %v369_v61  ;;  %vm396_vm10 = vcmp.eq.s32.totalorder %v2345_v18, %v366_v62 }
  0xe7   :  { %v1783_v0 = vsel %vm397_vm9, 1.0, %v2081_v26  ;;  %v1782_v1 = vsel %vm396_vm10, 1.0, %v2081_v26 }
  0xe8   :  { %1918 = vmatprep.mubr.msk.bf16.mxu1 %vm940_vm5, %v336_v63  ;;  %v440_v6 = vpack.c.bf16 %v1783_v0, %v1782_v1 }
  0xe9   :  { %v473_v2 = vpop.permute.xlu1 %472  ;;  %v470_v3 = vpop.permute.xlu0 %469 }
  0xea   :  { %vm501_vm11 = vcmp.eq.s32.totalorder %v2345_v18, %v473_v2  ;;  %vm500_vm12 = vcmp.eq.s32.totalorder %v2345_v18, %v470_v3 }
  0xeb   :  { %v1799_v4 = vsel %vm501_vm11, 1.0, %v2081_v26  ;;  %v1798_v5 = vsel %vm500_vm12, 1.0, %v2081_v26 }
  0xec   :  { %v544_v7 = vpack.c.bf16 %v1799_v4, %v1798_v5 }
  0xed   :  { %v159_v8 = vpop.permute.xlu1 %158  ;;  %v156_v9 = vpop.permute.xlu0 %155 }
  0xee   :  { %v552_v10 = vsub.bf16 %v440_v6, %v544_v7  ;;  %vm183_vm13 = vcmp.eq.s32.totalorder %v2345_v18, %v159_v8  ;;  %vm182_vm14 = vcmp.eq.s32.totalorder %v2345_v18, %v156_v9 }
  0xef   :  { %v1753_v11 = vsel %vm183_vm13, 1.0, %v2081_v26  ;;  %v1752_v12 = vsel %vm182_vm14, 1.0, %v2081_v26 }
  0xf0   :  { %1942 = vmatprep.mubr.msk.bf16.mxu0 %vm940_vm5, %v552_v10  ;;  %v225_v19 = vpack.c.bf16 %v1753_v11, %v1752_v12 }
  0xf1   :  { %v263_v13 = vpop.permute.xlu1 %262  ;;  %v260_v14 = vpop.permute.xlu0 %259 }
  0xf2   :  { %vm287_vm15 = vcmp.eq.s32.totalorder %v2345_v18, %v263_v13  ;;  %vm286_vm1 = vcmp.eq.s32.totalorder %v2345_v18, %v260_v14 }
  0xf3   :  { %v1769_v16 = vsel %vm287_vm15, 1.0, %v2081_v26  ;;  %v1768_v17 = vsel %vm286_vm1, 1.0, %v2081_v26 }
  0xf4   :  { %v329_v20 = vpack.c.bf16 %v1769_v16, %v1768_v17 }
  0xf5   :  { %v375_v28 = vpop.permute.xlu1 %374  ;;  %v372_v21 = vpop.permute.xlu0 %371 }
  0xf6   :  { %v337_v22 = vsub.bf16 %v225_v19, %v329_v20  ;;  %vm399_vm2 = vcmp.eq.s32.totalorder %v2345_v18, %v375_v28  ;;  %vm398_vm3 = vcmp.eq.s32.totalorder %v2345_v18, %v372_v21 }
  0xf7   :  { %v1785_v23 = vsel %vm399_vm2, 1.0, %v2081_v26  ;;  %v1784_v24 = vsel %vm398_vm3, 1.0, %v2081_v26 }
  0xf8   :  { %1919 = vmatmul.mubr.msk.bf16.gmra.mxu1 %vm940_vm5, %v337_v22  ;;  %v441_v31 = vpack.c.bf16 %v1785_v23, %v1784_v24 }
  0xf9   :  { %v479_v25 = vpop.permute.xlu1 %478  ;;  %v476_v27 = vpop.permute.xlu0 %475 }
  0xfa   :  { %vm503_vm4 = vcmp.eq.s32.totalorder %v2345_v18, %v479_v25  ;;  %vm502_vm0 = vcmp.eq.s32.totalorder %v2345_v18, %v476_v27 }
  0xfb   :  { %v1801_v29 = vsel %vm503_vm4, 1.0, %v2081_v26  ;;  %v1800_v30 = vsel %vm502_vm0, 1.0, %v2081_v26 }
  0xfc   :  { %v545_v32 = vpack.c.bf16 %v1801_v29, %v1800_v30 }
  0xfd   :  { %v165_v33 = vpop.permute.xlu1 %164  ;;  %v162_v34 = vpop.permute.xlu0 %161 }
  0xfe   :  { %v553_v35 = vsub.bf16 %v441_v31, %v545_v32  ;;  %vm185_vm6 = vcmp.eq.s32.totalorder %v2345_v18, %v165_v33  ;;  %vm184_vm7 = vcmp.eq.s32.totalorder %v2345_v18, %v162_v34 }
  0xff   :  { %v1755_v36 = vsel %vm185_vm6, 1.0, %v2081_v26  ;;  %v1754_v37 = vsel %vm184_vm7, 1.0, %v2081_v26 }
 0x100   :  { %1943 = vmatmul.mubr.msk.bf16.gmra.mxu0 %vm940_vm5, %v553_v35  ;;  %v226_v42 = vpack.c.bf16 %v1755_v36, %v1754_v37 }
 0x101   :  { %v269_v38 = vpop.permute.xlu1 %268  ;;  %v266_v39 = vpop.permute.xlu0 %265 }
 0x102   :  { %vm289_vm8 = vcmp.eq.s32.totalorder %v2345_v18, %v269_v38  ;;  %vm288_vm9 = vcmp.eq.s32.totalorder %v2345_v18, %v266_v39 }
 0x103   :  { %v1771_v40 = vsel %vm289_vm8, 1.0, %v2081_v26  ;;  %v1770_v41 = vsel %vm288_vm9, 1.0, %v2081_v26 }
 0x104   :  { %v330_v43 = vpack.c.bf16 %v1771_v40, %v1770_v41 }
 0x105   :  { %v381_v44 = vpop.permute.xlu1 %380  ;;  %v378_v45 = vpop.permute.xlu0 %377 }
 0x106   :  { %v338_v46 = vsub.bf16 %v226_v42, %v330_v43  ;;  %vm401_vm10 = vcmp.eq.s32.totalorder %v2345_v18, %v381_v44  ;;  %vm400_vm11 = vcmp.eq.s32.totalorder %v2345_v18, %v378_v45 }
 0x107   :  { %v1787_v47 = vsel %vm401_vm10, 1.0, %v2081_v26  ;;  %v1786_v48 = vsel %vm400_vm11, 1.0, %v2081_v26 }
 0x108   :  { %1922 = vmatprep.mubr.msk.bf16.mxu1 %vm940_vm5, %v338_v46  ;;  %v442_v53 = vpack.c.bf16 %v1787_v47, %v1786_v48 }
 0x109   :  { %v485_v49 = vpop.permute.xlu1 %484  ;;  %v482_v50 = vpop.permute.xlu0 %481 }
 0x10a   :  { %vm505_vm12 = vcmp.eq.s32.totalorder %v2345_v18, %v485_v49  ;;  %vm504_vm13 = vcmp.eq.s32.totalorder %v2345_v18, %v482_v50 }
 0x10b   :  { %v1803_v51 = vsel %vm505_vm12, 1.0, %v2081_v26  ;;  %v1802_v52 = vsel %vm504_vm13, 1.0, %v2081_v26 }
 0x10c   :  { %v546_v54 = vpack.c.bf16 %v1803_v51, %v1802_v52 }
 0x10d   :  { %v171_v55 = vpop.permute.xlu1 %170  ;;  %v168_v56 = vpop.permute.xlu0 %167 }
 0x10e   :  { %v554_v57 = vsub.bf16 %v442_v53, %v546_v54  ;;  %vm187_vm14 = vcmp.eq.s32.totalorder %v2345_v18, %v171_v55  ;;  %vm186_vm15 = vcmp.eq.s32.totalorder %v2345_v18, %v168_v56 }
 0x10f   :  { %v1757_v58 = vsel %vm187_vm14, 1.0, %v2081_v26  ;;  %v1756_v59 = vsel %vm186_vm15, 1.0, %v2081_v26 }
 0x110   :  { %1946 = vmatprep.mubr.msk.bf16.mxu0 %vm940_vm5, %v554_v57  ;;  %v227_v0 = vpack.c.bf16 %v1757_v58, %v1756_v59 }
 0x111   :  { %v275_v60 = vpop.permute.xlu1 %274  ;;  %v272_v61 = vpop.permute.xlu0 %271 }
 0x112   :  { %vm291_vm1 = vcmp.eq.s32.totalorder %v2345_v18, %v275_v60  ;;  %vm290_vm2 = vcmp.eq.s32.totalorder %v2345_v18, %v272_v61 }
 0x113   :  { %v1773_v62 = vsel %vm291_vm1, 1.0, %v2081_v26  ;;  %v1772_v63 = vsel %vm290_vm2, 1.0, %v2081_v26 }
 0x114   :  { %v331_v1 = vpack.c.bf16 %v1773_v62, %v1772_v63 }
 0x115   :  { %v387_v2 = vpop.permute.xlu1 %386  ;;  %v384_v3 = vpop.permute.xlu0 %383 }
 0x116   :  { %v339_v4 = vsub.bf16 %v227_v0, %v331_v1  ;;  %vm403_vm3 = vcmp.eq.s32.totalorder %v2345_v18, %v387_v2  ;;  %vm402_vm4 = vcmp.eq.s32.totalorder %v2345_v18, %v384_v3 }
 0x117   :  { %v1789_v5 = vsel %vm403_vm3, 1.0, %v2081_v26  ;;  %v1788_v6 = vsel %vm402_vm4, 1.0, %v2081_v26 }
 0x118   :  { %1923 = vmatmul.mubr.msk.bf16.gmra.mxu1 %vm940_vm5, %v339_v4  ;;  %v443_v11 = vpack.c.bf16 %v1789_v5, %v1788_v6 }
 0x119   :  { %v491_v7 = vpop.permute.xlu1 %490  ;;  %v488_v8 = vpop.permute.xlu0 %487 }
 0x11a   :  { %vm507_vm0 = vcmp.eq.s32.totalorder %v2345_v18, %v491_v7  ;;  %vm506_vm6 = vcmp.eq.s32.totalorder %v2345_v18, %v488_v8 }
 0x11b   :  { %v1805_v9 = vsel %vm507_vm0, 1.0, %v2081_v26  ;;  %v1804_v10 = vsel %vm506_vm6, 1.0, %v2081_v26 }
 0x11c   :  { %v547_v12 = vpack.c.bf16 %v1805_v9, %v1804_v10 }
 0x11e   :  { %v555_v13 = vsub.bf16 %v443_v11, %v547_v12 }
 0x120   :  { %1947 = vmatmul.mubr.msk.bf16.gmra.mxu0 %vm940_vm5, %v555_v13 }
 0x148   :  { %v1888_v14 = vpop.f32.mrf.mxu0 }
 0x149   :  { %v806_v16 = vmul.f32 %v1888_v14, %v1888_v14 }
 0x14a   :  { %v2612_v17 = vpop.f32.mrf.mxu0 }
 0x14b   :  { %824 = vadd.xlane.f32.xlu0 %v806_v16  ;;  %v804_v19 = vmul.f32 %v2612_v17, %v2612_v17 }
 0x14c   :  { %v2616_v20 = vpop.f32.mrf.mxu0 }
 0x14d   :  { %v807_v28 = vmul.f32 %v2616_v20, %v2616_v20 }
 0x14e   :  { %v2620_v26 = vpop.f32.mrf.mxu0 }
 0x14f   :  { %820 = vadd.xlane.f32.xlu0 %v804_v19  ;;  %v805_v31 = vmul.f32 %v2620_v26, %v2620_v26 }
 0x153   :  { %826 = vadd.xlane.f32.xlu0 %v807_v28  ;;  %v2622_v21 = vpop.f32.mrf.mxu0 }
 0x154   :  { %v810_v34 = vmul.f32 %v2622_v21, %v2622_v21 }
 0x155   :  { %v2630_v25 = vpop.f32.mrf.mxu0 }
 0x156   :  { %v808_v38 = vmul.f32 %v2630_v25, %v2630_v25 }
 0x157   :  { %v2624_v22 = vpop.f32.mrf.mxu1  ;;  %v2640_v32 = vpop.f32.mrf.mxu0 }
 0x158   :  { %v811_v35 = vmul.f32 %v2640_v32, %v2640_v32  ;;  %v814_v41 = vmul.f32 %v2624_v22, %v2624_v22 }
 0x159   :  { %v2626_v23 = vpop.f32.mrf.mxu1  ;;  %v2648_v36 = vpop.f32.mrf.mxu0 }
 0x15a   :  { %v812_v24 = vmul.f32 %v2626_v23, %v2626_v23  ;;  %v809_v39 = vmul.f32 %v2648_v36, %v2648_v36 }
 0x15b   :  { %v2632_v27 = vpop.f32.mrf.mxu1 }
 0x15c   :  { %836 = vadd.xlane.f32.xlu1 %v812_v24  ;;  %v815_v42 = vmul.f32 %v2632_v27, %v2632_v27 }
 0x15d   :  { %v2634_v29 = vpop.f32.mrf.mxu1 }
 0x15e   :  { %v813_v30 = vmul.f32 %v2634_v29, %v2634_v29 }
 0x15f   :  { %v2642_v33 = vpop.f32.mrf.mxu1 }
 0x160   :  { %838 = vadd.xlane.f32.xlu0 %v813_v30  ;;  %822 = vadd.xlane.f32.xlu1 %v805_v31  ;;  %v818_v46 = vmul.f32 %v2642_v33, %v2642_v33 }
 0x161   :  { %v2650_v37 = vpop.f32.mrf.mxu1 }
 0x162   :  { %v816_v44 = vmul.f32 %v2650_v37, %v2650_v37 }
 0x163   :  { %v2656_v40 = vpop.f32.mrf.mxu1 }
 0x164   :  { %832 = vadd.xlane.f32.xlu1 %v810_v34  ;;  %834 = vadd.xlane.f32.xlu0 %v811_v35  ;;  %v819_v47 = vmul.f32 %v2656_v40, %v2656_v40 }
 0x165   :  { %v2662_v43 = vpop.f32.mrf.mxu1 }
 0x166   :  { %v817_v45 = vmul.f32 %v2662_v43, %v2662_v43 }
 0x168   :  { %828 = vadd.xlane.f32.xlu1 %v808_v38  ;;  %830 = vadd.xlane.f32.xlu0 %v809_v39 }
 0x16c   :  { %840 = vadd.xlane.f32.xlu1 %v814_v41  ;;  %842 = vadd.xlane.f32.xlu0 %v815_v42 }
 0x170   :  { %844 = vadd.xlane.f32.xlu1 %v816_v44  ;;  %846 = vadd.xlane.f32.xlu0 %v817_v45 }
 0x174   :  { %848 = vadd.xlane.f32.xlu1 %v818_v46  ;;  %850 = vadd.xlane.f32.xlu0 %v819_v47 }
 0x178   :  { %v1912_v56 = vpop.f32.mrf.mxu1 }
 0x17a   :  { %v999_v4 = vpop.f32.mrf.mxu1 }
 0x17c   :  { %v2678_v10 = vpop.f32.mrf.mxu1 }
 0x17e   :  { %v2682_v19 = vpop.f32.mrf.mxu1 }
 0x180   :  { %v1936_v57 = vpop.f32.mrf.mxu0 }
 0x182   :  { %v2674_v2 = vpop.f32.mrf.mxu0 }
 0x184   :  { %v1937_v8 = vpop.f32.mrf.mxu0 }
 0x198   :  { %v2686_v24 = vpop.f32.mrf.mxu1 }
 0x19a   :  { %v2690_v34 = vpop.f32.mrf.mxu1 }
 0x19c   :  { %v2694_v41 = vpop.f32.mrf.mxu1 }
 0x1d4   :  { %v825_v48 = vpop.xlane.xlu0 %824 }
 0x1d5   :  { %v854_v49 = vadd.f32 1e-12, %v825_v48 }
 0x1d7   :  { %1962 = vrsqrt.f32 %v854_v49 }
 0x1d8   :  { %v821_v50 = vpop.xlane.xlu0 %820 }
 0x1d9   :  { %v852_v3 = vadd.f32 1e-12, %v821_v50  ;;  %v2698_v50 = vpop.f32.mrf.mxu1 }
 0x1db   :  { %1964 = vrsqrt.f32 %v852_v3 }
 0x1dc   :  { %v827_v53 = vpop.xlane.xlu0 %826 }
 0x1dd   :  { %v855_v9 = vadd.f32 1e-12, %v827_v53 }
 0x1e4   :  { %v1963_v51 = vpop.eup %1962 }
 0x1e5   :  { %v886_v52 = vmin.f32 %v1963_v51, 1.0  ;;  %v837_v54 = vpop.xlane.xlu1 %836 }
 0x1e6   :  { %v860_v5 = vadd.f32 1e-12, %v837_v54 }
 0x1e7   :  { %v902_v55 = vmul.f32 %v1888_v14, %v886_v52  ;;  %v2680_v14 = vpop.f32.mrf.mxu0 }
 0x1e8   :  { %1966 = vrsqrt.f32 %v860_v5  ;;  %v1965_v35 = vpop.eup %1964 }
 0x1e9   :  { %v839_v58 = vpop.xlane.xlu0 %838  ;;  %v823_v59 = vpop.xlane.xlu1 %822  ;;  %v1129_v60 = vadd.f32 %v1936_v57, %v902_v55  ;;  %v1008_v61 = vadd.f32 %v1912_v56, %v902_v55  ;;  %1968 = vrsqrt.f32 %v855_v9  ;;  %v884_v42 = vmin.f32 %v1965_v35, 1.0 }
 0x1ea   :  { %v2684_v28 = vpop.f32.mrf.mxu0  ;;  %v853_v30 = vadd.f32 1e-12, %v823_v59  ;;  %v861_v44 = vadd.f32 1e-12, %v839_v58  ;;  %v1920_v58 = vpop.f32.mrf.mxu1 }
 0x1eb   :  { %v1345_v62 = vmul.f32 %v1129_v60, %v1129_v60  ;;  %v1185_v63 = vmul.f32 %v1008_v61, %v1008_v61  ;;  %v900_v54 = vmul.f32 %v884_v42, %v2612_v17 }
 0x1ec   :  { %v2688_v31 = vpop.f32.mrf.mxu0 }
 0x1ed   :  { %v833_v0 = vpop.xlane.xlu1 %832  ;;  %v2672_v1 = vpop.xlane.xlu0 %834  ;;  %1363 = vadd.xlane.f32.xlu0 %v1345_v62  ;;  %1203 = vadd.xlane.f32.xlu1 %v1185_v63  ;;  %v1000_v63 = vadd.f32 %v999_v4, %v900_v54 }
 0x1ee   :  { %v2692_v39 = vpop.f32.mrf.mxu0  ;;  %v858_v53 = vadd.f32 1e-12, %v833_v0 }
 0x1f0   :  { %v2696_v48 = vpop.f32.mrf.mxu0 }
 0x1f1   :  { %v829_v6 = vpop.xlane.xlu1 %828  ;;  %v2676_v7 = vpop.xlane.xlu0 %830 }
 0x1f2   :  { %v1944_v51 = vpop.f32.mrf.mxu0  ;;  %v856_v62 = vadd.f32 1e-12, %v829_v6 }
 0x1f4   :  { %v1152_v61 = vpop.f32.mrf.mxu0 }
 0x1f5   :  { %v841_v11 = vpop.xlane.xlu1 %840  ;;  %v843_v12 = vpop.xlane.xlu0 %842 }
 0x1f6   :  { %v862_v13 = vadd.f32 1e-12, %v841_v11  ;;  %v863_v16 = vadd.f32 1e-12, %v843_v12  ;;  %v1967_v38 = vpop.eup %1966  ;;  %v1945_v6 = vpop.f32.mrf.mxu0 }
 0x1f7   :  { %v1969_v45 = vpop.eup %1968  ;;  %v892_v46 = vmin.f32 %v1967_v38, 1.0  ;;  %v859_v38 = vadd.f32 1e-12, %v2672_v1 }
 0x1f8   :  { %1970 = vrsqrt.f32 %v862_v13  ;;  %v887_v52 = vmin.f32 %v1969_v45, 1.0  ;;  %v1121_v13 = vadd.f32 %v2674_v2, %v900_v54 }
 0x1f9   :  { %1972 = vrsqrt.f32 %v863_v16  ;;  %v908_v56 = vmul.f32 %v892_v46, %v2626_v23  ;;  %v845_v17 = vpop.xlane.xlu1 %844 }
 0x1fa   :  { %1974 = vrsqrt.f32 %v853_v30  ;;  %v903_v3 = vmul.f32 %v2616_v20, %v887_v52  ;;  %v864_v30 = vadd.f32 1e-12, %v845_v17  ;;  %v1031_v20 = vpop.f32.mrf.mxu1 }
 0x1fb   :  { %1976 = vrsqrt.f32 %v861_v44  ;;  %v1153_v0 = vadd.f32 %v1152_v61, %v908_v56  ;;  %v1343_v44 = vmul.f32 %v1121_v13, %v1121_v13 }
 0x1fc   :  { %1978 = vrsqrt.f32 %v858_v53  ;;  %v1132_v23 = vadd.f32 %v1937_v8, %v903_v3 }
 0x1fd   :  { %1980 = vrsqrt.f32 %v856_v62  ;;  %v1351_v35 = vmul.f32 %v1153_v0, %v1153_v0  ;;  %v849_v54 = vpop.xlane.xlu1 %848 }
 0x1fe   :  { %v1346_v42 = vmul.f32 %v1132_v23, %v1132_v23  ;;  %1982 = vrsqrt.f32 %v864_v30 }
 0x1ff   :  { %1984 = vrsqrt.f32 %v859_v38 }
 0x205   :  { %v1971_v47 = vpop.eup %1970 }
 0x206   :  { %v894_v49 = vmin.f32 %v1971_v47, 1.0  ;;  %v1973_v57 = vpop.eup %1972  ;;  %v1032_v47 = vadd.f32 %v1031_v20, %v908_v56 }
 0x207   :  { %v895_v5 = vmin.f32 %v1973_v57, 1.0  ;;  %v1975_v12 = vpop.eup %1974  ;;  %v847_v57 = vpop.xlane.xlu0 %846 }
 0x208   :  { %v910_v55 = vmul.f32 %v2624_v22, %v894_v49  ;;  %v1183_v22 = vmul.f32 %v1000_v63, %v1000_v63  ;;  %v885_v16 = vmin.f32 %v1975_v12, 1.0  ;;  %v1977_v45 = vpop.eup %1976  ;;  %v1011_v49 = vadd.f32 %v2678_v10, %v903_v3  ;;  %v1155_v63 = vpop.f32.mrf.mxu0 }
 0x209   :  { %v911_v4 = vmul.f32 %v2632_v27, %v895_v5  ;;  %v893_v2 = vmin.f32 %v1977_v45, 1.0  ;;  %v857_v27 = vadd.f32 1e-12, %v2676_v7  ;;  %v1191_v53 = vmul.f32 %v1032_v47, %v1032_v47 }
 0x20a   :  { %v1161_v59 = vadd.f32 %v1944_v51, %v910_v55  ;;  %v1040_v60 = vadd.f32 %v1920_v58, %v910_v55  ;;  %v901_v8 = vmul.f32 %v885_v16, %v2620_v26  ;;  %v1979_v51 = vpop.eup %1978  ;;  %v1921_v55 = vpop.f32.mrf.mxu1  ;;  %v1186_v26 = vmul.f32 %v1011_v49, %v1011_v49 }
 0x20b   :  { %v1164_v46 = vadd.f32 %v1945_v6, %v911_v4  ;;  %v890_v56 = vmin.f32 %v1979_v51, 1.0  ;;  %1986 = vrsqrt.f32 %v857_v27  ;;  %v909_v58 = vmul.f32 %v893_v2, %v2634_v29  ;;  %v851_v0 = vpop.xlane.xlu0 %850  ;;  %v1948_v20 = vpop.f32.mrf.mxu0 }
 0x20c   :  { %v1353_v9 = vmul.f32 %v1161_v59, %v1161_v59  ;;  %v1193_v11 = vmul.f32 %v1040_v60, %v1040_v60  ;;  %v1003_v1 = vadd.f32 %v2682_v19, %v901_v8  ;;  %v1981_v59 = vpop.eup %1980  ;;  %v866_v60 = vadd.f32 1e-12, %v849_v54  ;;  %v1034_v62 = vpop.f32.mrf.mxu1 }
 0x20d   :  { %v1354_v52 = vmul.f32 %v1164_v46, %v1164_v46  ;;  %v1124_v10 = vadd.f32 %v2680_v14, %v901_v8  ;;  %v1043_v61 = vadd.f32 %v1921_v55, %v911_v4  ;;  %v865_v19 = vadd.f32 1e-12, %v847_v57  ;;  %v1983_v17 = vpop.eup %1982  ;;  %v1168_v47 = vpop.f32.mrf.mxu0 }
 0x20e   :  { %1379 = vadd.xlane.f32.xlu0 %v1353_v9  ;;  %1219 = vadd.xlane.f32.xlu1 %v1193_v11  ;;  %v1184_v7 = vmul.f32 %v1003_v1, %v1003_v1  ;;  %v1156_v3 = vadd.f32 %v1155_v63, %v909_v58  ;;  %v1035_v5 = vadd.f32 %v1034_v62, %v909_v58  ;;  %v888_v11 = vmin.f32 %v1981_v59, 1.0  ;;  %v1985_v13 = vpop.eup %1984  ;;  %v1924_v4 = vpop.f32.mrf.mxu1 }
 0x20f   :  { %v906_v9 = vmul.f32 %v2622_v21, %v890_v56  ;;  %1988 = vrsqrt.f32 %v866_v60  ;;  %v1344_v12 = vmul.f32 %v1124_v10, %v1124_v10  ;;  %v1194_v29 = vmul.f32 %v1043_v61, %v1043_v61  ;;  %v1949_v60 = vpop.f32.mrf.mxu0 }
 0x210   :  { %1990 = vrsqrt.f32 %v865_v19  ;;  %v867_v14 = vadd.f32 1e-12, %v851_v0  ;;  %v896_v16 = vmin.f32 %v1983_v17, 1.0  ;;  %v1192_v30 = vmul.f32 %v1035_v5, %v1035_v5 }
 0x211   :  { %v1145_v23 = vadd.f32 %v2684_v28, %v906_v9  ;;  %v904_v21 = vmul.f32 %v888_v11, %v2630_v25  ;;  %v891_v6 = vmin.f32 %v1985_v13, 1.0  ;;  %v1171_v19 = vpop.f32.mrf.mxu0 }
 0x212   :  { %1375 = vadd.xlane.f32.xlu0 %v1351_v35  ;;  %1199 = vadd.xlane.f32.xlu1 %v1183_v22  ;;  %v1352_v22 = vmul.f32 %v1156_v3, %v1156_v3  ;;  %v1024_v35 = vadd.f32 %v2686_v24, %v906_v9  ;;  %1992 = vrsqrt.f32 %v867_v14  ;;  %v912_v46 = vmul.f32 %v896_v16, %v2650_v37  ;;  %v1047_v24 = vpop.f32.mrf.mxu1 }
 0x213   :  { %v1349_v38 = vmul.f32 %v1145_v23, %v1145_v23  ;;  %v1137_v45 = vadd.f32 %v2688_v31, %v904_v21  ;;  %v1016_v28 = vadd.f32 %v2690_v34, %v904_v21  ;;  %v907_v8 = vmul.f32 %v2640_v32, %v891_v6 }
 0x214   :  { %v1169_v49 = vadd.f32 %v1168_v47, %v912_v46  ;;  %v1048_v51 = vadd.f32 %v1047_v24, %v912_v46  ;;  %v1530_v16 = vadd.s32 4294967280, %v2345_v18 }
 0x215   :  { %v1347_v2 = vmul.f32 %v1137_v45, %v1137_v45  ;;  %v1187_v27 = vmul.f32 %v1016_v28, %v1016_v28  ;;  %v1148_v31 = vadd.f32 %v2692_v39, %v907_v8  ;;  %v1027_v55 = vadd.f32 %v2694_v41, %v907_v8 }
 0x216   :  { %1365 = vadd.xlane.f32.xlu0 %v1346_v42  ;;  %1359 = vadd.xlane.f32.xlu1 %v1343_v44  ;;  %v1189_v44 = vmul.f32 %v1024_v35, %v1024_v35  ;;  %v1355_v1 = vmul.f32 %v1169_v49, %v1169_v49  ;;  %v1195_v54 = vmul.f32 %v1048_v51, %v1048_v51 }
 0x217   :  { %v1190_v58 = vmul.f32 %v1027_v55, %v1027_v55 }
 0x218   :  { %v1987_v42 = vpop.eup %1986 }
 0x219   :  { %v889_v25 = vmin.f32 %v1987_v42, 1.0  ;;  %v1523_v42 = vadd.s32 4294967288, %v2345_v18 }
 0x21a   :  { %1381 = vadd.xlane.f32.xlu0 %v1354_v52  ;;  %1215 = vadd.xlane.f32.xlu1 %v1191_v53 }
 0x21b   :  { %v905_v34 = vmul.f32 %v889_v25, %v2648_v36  ;;  %v1925_v36 = vpop.f32.mrf.mxu1 }
 0x21c   :  { %v1989_v52 = vpop.eup %1988 }
 0x21d   :  { %v1991_v53 = vpop.eup %1990  ;;  %v898_v37 = vmin.f32 %v1989_v52, 1.0  ;;  %v1140_v57 = vadd.f32 %v2696_v48, %v905_v34  ;;  %v1019_v59 = vadd.f32 %v2698_v50, %v905_v34  ;;  %v1050_v48 = vpop.f32.mrf.mxu1  ;;  %v1544_v34 = vadd.s32 4294967264, %v2345_v18 }
 0x21e   :  { %1201 = vadd.xlane.f32.xlu0 %v1184_v7  ;;  %1205 = vadd.xlane.f32.xlu1 %v1186_v26  ;;  %v897_v32 = vmin.f32 %v1991_v53, 1.0  ;;  %v1350_v26 = vmul.f32 %v1148_v31, %v1148_v31  ;;  %v1558_v31 = vadd.s32 4294967248, %v2345_v18  ;;  %v1600_v53 = vadd.s32 4294967200, %v2345_v18 }
 0x21f   :  { %v1993_v56 = vpop.eup %1992  ;;  %v914_v39 = vmul.f32 %v2642_v33, %v898_v37  ;;  %v1348_v7 = vmul.f32 %v1140_v57, %v1140_v57  ;;  %v1188_v61 = vmul.f32 %v1019_v59, %v1019_v59  ;;  %v1551_v57 = vadd.s32 4294967256, %v2345_v18 }
 0x220   :  { %v913_v10 = vmul.f32 %v897_v32, %v2662_v43  ;;  %v899_v41 = vmin.f32 %v1993_v56, 1.0  ;;  %v1614_v59 = vadd.s32 4294967184, %v2345_v18 }
 0x221   :  { %v1177_v62 = vadd.f32 %v1948_v20, %v914_v39  ;;  %v1056_v63 = vadd.f32 %v1924_v4, %v914_v39  ;;  %v1572_v20 = vadd.s32 4294967232, %v2345_v18 }
 0x222   :  { %1361 = vadd.xlane.f32.xlu0 %v1344_v12  ;;  %1221 = vadd.xlane.f32.xlu1 %v1194_v29  ;;  %v1172_v3 = vadd.f32 %v1171_v19, %v913_v10  ;;  %v1051_v9 = vadd.f32 %v1050_v48, %v913_v10  ;;  %v915_v33 = vmul.f32 %v2656_v40, %v899_v41  ;;  %v2735_v40 = vshrl.u32 %v37_v15, 7 }
 0x223   :  { %v1357_v5 = vmul.f32 %v1177_v62, %v1177_v62  ;;  %v1197_v50 = vmul.f32 %v1056_v63, %v1056_v63  ;;  %v1593_v15 = vadd.s32 4294967208, %v2345_v18 }
 0x224   :  { %v1356_v11 = vmul.f32 %v1172_v3, %v1172_v3  ;;  %v1196_v0 = vmul.f32 %v1051_v9, %v1051_v9  ;;  %v1180_v12 = vadd.f32 %v1949_v60, %v915_v33  ;;  %v1059_v43 = vadd.f32 %v1925_v36, %v915_v33 }
 0x225   :  { %v2751_v45 = vsub.s32 %v1530_v16, %v2735_v40  ;;  %v2761_v8 = vsub.s32 %v1572_v20, %v2735_v40  ;;  %v2772_v49 = vsub.s32 %v1593_v15, %v2735_v40  ;;  %v2775_v51 = vsub.s32 %v1523_v42, %v2735_v40 }
 0x226   :  { %1377 = vadd.xlane.f32.xlu0 %v1352_v22  ;;  %1217 = vadd.xlane.f32.xlu1 %v1192_v30  ;;  %v1358_v29 = vmul.f32 %v1180_v12, %v1180_v12  ;;  %v1198_v17 = vmul.f32 %v1059_v43, %v1059_v43  ;;  %v1586_v30 = vadd.s32 4294967216, %v2345_v18  ;;  %v1621_v60 = vadd.s32 4294967176, %v2345_v18 }
 0x227   :  { %v2809_v63 = vsub.s32 %v1544_v34, %v2735_v40  ;;  %v2820_v3 = vsub.s32 %v1551_v57, %v2735_v40 }
 0x228   :  { %v2754_v28 = vsub.s32 %v1586_v30, %v2735_v40 }
 0x22a   :  { %1371 = vadd.xlane.f32.xlu0 %v1349_v38  ;;  %1211 = vadd.xlane.f32.xlu1 %v1189_v44  ;;  %v1537_v38 = vadd.s32 4294967272, %v2345_v18  ;;  %v1579_v44 = vadd.s32 4294967224, %v2345_v18 }
 0x22c   :  { %v2778_v52 = vsub.s32 %v1579_v44, %v2735_v40 }
 0x22e   :  { %1367 = vadd.xlane.f32.xlu0 %v1347_v2  ;;  %1207 = vadd.xlane.f32.xlu1 %v1187_v27  ;;  %v2766_v2 = vsub.s32 %v2345_v18, %v2735_v40  ;;  %v2769_v27 = vsub.s32 %v1537_v38, %v2735_v40 }
 0x232   :  { %1383 = vadd.xlane.f32.xlu0 %v1355_v1  ;;  %1223 = vadd.xlane.f32.xlu1 %v1195_v54  ;;  %v1565_v54 = vadd.s32 4294967240, %v2345_v18 }
 0x234   :  { %v2815_v19 = vsub.s32 %v1565_v54, %v2735_v40 }
 0x236   :  { %1373 = vadd.xlane.f32.xlu0 %v1350_v26  ;;  %1213 = vadd.xlane.f32.xlu1 %v1190_v58  ;;  %v1607_v58 = vadd.s32 4294967192, %v2345_v18  ;;  %v2812_v18 = vsub.s32 %v1600_v53, %v2735_v40 }
 0x23a   :  { %1369 = vadd.xlane.f32.xlu0 %v1348_v7  ;;  %1209 = vadd.xlane.f32.xlu1 %v1188_v61  ;;  %v2805_v61 = vsub.s32 %v1558_v31, %v2735_v40 }
 0x23e   :  { %1387 = vadd.xlane.f32.xlu0 %v1357_v5  ;;  %1227 = vadd.xlane.f32.xlu1 %v1197_v50  ;;  %v2823_v5 = vsub.s32 %v1614_v59, %v2735_v40 }
 0x242   :  { %1385 = vadd.xlane.f32.xlu0 %v1356_v11  ;;  %1225 = vadd.xlane.f32.xlu1 %v1196_v0  ;;  %v2830_v11 = vsub.s32 %v1607_v58, %v2735_v40  ;;  %v2833_v0 = vsub.s32 %v1621_v60, %v2735_v40 }
 0x246   :  { %1389 = vadd.xlane.f32.xlu0 %v1358_v29  ;;  %1229 = vadd.xlane.f32.xlu1 %v1198_v17 }
 0x276   :  { %v1364_v14 = vpop.xlane.xlu0 %1363  ;;  %v1204_v22 = vpop.xlane.xlu1 %1203 }
 0x277   :  { %1994 = vrsqrt.f32 %v1364_v14  ;;  %vm1407_vm5 = vcmp.eq.f32.partialorder %v1364_v14, inf  ;;  %vm1247_vm7 = vcmp.eq.f32.partialorder %v1204_v22, inf  ;;  %v1410_v56 = vand.u32 2147483648, %v1364_v14 }
 0x278   :  { %1996 = vrsqrt.f32 %v1204_v22  ;;  %v1250_v26 = vand.u32 2147483648, %v1204_v22  ;;  %vm1409_vm8 = vcmp.eq.f32.partialorder %v1364_v14, 0.0  ;;  %vm1249_vm9 = vcmp.eq.f32.partialorder %v1204_v22, 0.0 }
 0x284   :  { %v1995_v4 = vpop.eup %1994 }
 0x285   :  { %v1997_v6 = vpop.eup %1996  ;;  %v1406_v47 = vmul.f32 %v1995_v4, %v1364_v14 }
 0x286   :  { %v1246_v25 = vmul.f32 %v1997_v6, %v1204_v22 }
 0x287   :  { %v1408_v55 = vsel %vm1407_vm5, %v1364_v14, %v1406_v47 }
 0x288   :  { %v1248_v32 = vsel %vm1247_vm7, %v1204_v22, %v1246_v25  ;;  %v2795_v36 = vsel %vm1409_vm8, %v1410_v56, %v1408_v55 }
 0x289   :  { %v2797_v7 = vsel %vm1249_vm9, %v1250_v26, %v1248_v32  ;;  %v1657_v9 = vrot.slane %v2795_v36, %v2751_v45 }
 0x28a   :  { %v1534_v33 = vrot.slane %v2797_v7, %v2751_v45 }
 0x297   :  { %v2729_v23 = vpop.xlane.xlu0 %1379  ;;  %v2731_v13 = vpop.xlane.xlu1 %1219 }
 0x298   :  { %1998 = vrsqrt.f32 %v2729_v23  ;;  %vm1463_vm10 = vcmp.eq.f32.partialorder %v2729_v23, inf  ;;  %vm1465_vm11 = vcmp.eq.f32.partialorder %v2729_v23, 0.0  ;;  %v1466_v12 = vand.u32 2147483648, %v2729_v23 }
 0x299   :  { %2000 = vrsqrt.f32 %v2731_v13  ;;  %vm1303_vm12 = vcmp.eq.f32.partialorder %v2731_v13, inf  ;;  %vm1305_vm13 = vcmp.eq.f32.partialorder %v2731_v13, 0.0  ;;  %v1306_v14 = vand.u32 2147483648, %v2731_v13 }
 0x29b   :  { %v2740_v35 = vpop.xlane.xlu0 %1375  ;;  %v2742_v21 = vpop.xlane.xlu1 %1199 }
 0x29c   :  { %2002 = vrsqrt.f32 %v2740_v35  ;;  %vm1449_vm14 = vcmp.eq.f32.partialorder %v2740_v35, inf  ;;  %vm1451_vm15 = vcmp.eq.f32.partialorder %v2740_v35, 0.0  ;;  %v1452_v30 = vand.u32 2147483648, %v2740_v35 }
 0x29d   :  { %2004 = vrsqrt.f32 %v2742_v21  ;;  %vm1233_vm1 = vcmp.eq.f32.partialorder %v2742_v21, inf  ;;  %vm1235_vm2 = vcmp.eq.f32.partialorder %v2742_v21, 0.0  ;;  %v1236_v20 = vand.u32 2147483648, %v2742_v21 }
 0x29f   :  { %v2756_v46 = vpop.xlane.xlu0 %1365  ;;  %v2758_v24 = vpop.xlane.xlu1 %1359 }
 0x2a0   :  { %2006 = vrsqrt.f32 %v2756_v46  ;;  %vm1414_vm3 = vcmp.eq.f32.partialorder %v2756_v46, inf  ;;  %v1417_v6 = vand.u32 2147483648, %v2756_v46  ;;  %vm1393_vm4 = vcmp.eq.f32.partialorder %v2758_v24, inf }
 0x2a1   :  { %2008 = vrsqrt.f32 %v2758_v24  ;;  %vm1416_vm0 = vcmp.eq.f32.partialorder %v2756_v46, 0.0  ;;  %v1396_v34 = vand.u32 2147483648, %v2758_v24  ;;  %vm1395_vm5 = vcmp.eq.f32.partialorder %v2758_v24, 0.0 }
 0x2a3   :  { %v2784_v37 = vpop.xlane.xlu0 %1381  ;;  %v2786_v1 = vpop.xlane.xlu1 %1215 }
 0x2a4   :  { %2010 = vrsqrt.f32 %v2784_v37  ;;  %vm1470_vm6 = vcmp.eq.f32.partialorder %v2784_v37, inf  ;;  %v1473_v53 = vand.u32 2147483648, %v2784_v37  ;;  %v1292_v54 = vand.u32 2147483648, %v2786_v1 }
 0x2a5   :  { %v1999_v39 = vpop.eup %1998  ;;  %2012 = vrsqrt.f32 %v2786_v1  ;;  %vm1289_vm8 = vcmp.eq.f32.partialorder %v2786_v1, inf }
 0x2a6   :  { %v2001_v62 = vpop.eup %2000  ;;  %v1462_v48 = vmul.f32 %v1999_v39, %v2729_v23 }
 0x2a7   :  { %v2800_v10 = vpop.xlane.xlu0 %1201  ;;  %v2802_v41 = vpop.xlane.xlu1 %1205  ;;  %v1302_v43 = vmul.f32 %v2001_v62, %v2731_v13 }
 0x2a8   :  { %2014 = vrsqrt.f32 %v2800_v10  ;;  %v1464_v40 = vsel %vm1463_vm10, %v2729_v23, %v1462_v48  ;;  %vm1240_vm7 = vcmp.eq.f32.partialorder %v2800_v10, inf  ;;  %vm1242_vm9 = vcmp.eq.f32.partialorder %v2800_v10, 0.0 }
 0x2a9   :  { %2016 = vrsqrt.f32 %v2802_v41  ;;  %v2003_v50 = vpop.eup %2002  ;;  %v1304_v4 = vsel %vm1303_vm12, %v2731_v13, %v1302_v43  ;;  %v2865_v44 = vsel %vm1465_vm11, %v1466_v12, %v1464_v40  ;;  %v1243_v13 = vand.u32 2147483648, %v2800_v10 }
 0x2aa   :  { %v2005_v22 = vpop.eup %2004  ;;  %v1448_v16 = vmul.f32 %v2003_v50, %v2740_v35  ;;  %v2879_v23 = vsel %vm1305_vm13, %v1306_v14, %v1304_v4  ;;  %v1697_v32 = vrot.slane %v2865_v44, %v2754_v28  ;;  %vm1472_vm10 = vcmp.eq.f32.partialorder %v2784_v37, 0.0 }
 0x2ab   :  { %v2839_v29 = vpop.xlane.xlu0 %1361  ;;  %v2841_v17 = vpop.xlane.xlu1 %1221  ;;  %v1232_v47 = vmul.f32 %v2005_v22, %v2742_v21  ;;  %v1590_v48 = vrot.slane %v2879_v23, %v2754_v28  ;;  %vm1528_vm11 = vcmask 130112   ;;  %vm1254_vm12 = vcmp.eq.f32.partialorder %v2802_v41, inf }
 0x2ac   :  { %2018 = vrsqrt.f32 %v2839_v29  ;;  %v1450_v31 = vsel %vm1449_vm14, %v2740_v35, %v1448_v16  ;;  %v1257_v35 = vand.u32 2147483648, %v2802_v41  ;;  %vm1291_vm13 = vcmp.eq.f32.partialorder %v2786_v1, 0.0 }
 0x2ad   :  { %2020 = vrsqrt.f32 %v2841_v17  ;;  %v2007_v42 = vpop.eup %2006  ;;  %v2897_v59 = vsel %vm1451_vm15, %v1452_v30, %v1450_v31  ;;  %v1234_v39 = vsel %vm1233_vm1, %v2742_v21, %v1232_v47  ;;  %vm1400_vm14 = vcmp.eq.f32.partialorder %v2839_v29, inf }
 0x2ae   :  { %v2009_v25 = vpop.eup %2008  ;;  %v1413_v57 = vmul.f32 %v2007_v42, %v2756_v46  ;;  %vm1402_vm15 = vcmp.eq.f32.partialorder %v2839_v29, 0.0  ;;  %v1687_v14 = vrot.slane %v2897_v59, %v2761_v8  ;;  %v1237_v22 = vsel %vm1235_vm2, %v1236_v20, %v1234_v39 }
 0x2af   :  { %v2859_v38 = vpop.xlane.xlu0 %1377  ;;  %v2861_v15 = vpop.xlane.xlu1 %1217  ;;  %v1392_v60 = vmul.f32 %v2009_v25, %v2758_v24  ;;  %vm1256_vm1 = vcmp.eq.f32.partialorder %v2802_v41, 0.0  ;;  %v1403_v16 = vand.u32 2147483648, %v2839_v29  ;;  %vm1535_vm2 = vcmask 195712  }
 0x2b0   :  { %2022 = vrsqrt.f32 %v2859_v38  ;;  %v1415_v40 = vsel %vm1414_vm3, %v2756_v46, %v1413_v57  ;;  %vm1310_vm3 = vcmp.eq.f32.partialorder %v2841_v17, inf  ;;  %v1522_v57 = vrot.slane %v1237_v22, %v2766_v2 }
 0x2b1   :  { %2024 = vrsqrt.f32 %v2861_v15  ;;  %v2011_v55 = vpop.eup %2010  ;;  %v1394_v42 = vsel %vm1393_vm4, %v2758_v24, %v1392_v60  ;;  %vm1542_vm4 = vcmask 261312   ;;  %v1313_v60 = vand.u32 2147483648, %v2841_v17 }
 0x2b2   :  { %v2013_v58 = vpop.eup %2012  ;;  %v1469_v12 = vmul.f32 %v2011_v55, %v2784_v37  ;;  %v1397_v39 = vsel %vm1395_vm5, %v1396_v34, %v1394_v42  ;;  %v1459_v46 = vand.u32 2147483648, %v2859_v38  ;;  %vm1298_vm5 = vcmp.eq.f32.partialorder %v2861_v15, 0.0 }
 0x2b3   :  { %v2891_v56 = vpop.xlane.xlu0 %1371  ;;  %v2893_v26 = vpop.xlane.xlu1 %1211  ;;  %v1288_v47 = vmul.f32 %v2013_v58, %v2786_v1  ;;  %v2946_v58 = vsel %vm1416_vm0, %v1417_v6, %v1415_v40  ;;  %vm1458_vm0 = vcmp.eq.f32.partialorder %v2859_v38, 0.0 }
 0x2b4   :  { %2026 = vrsqrt.f32 %v2891_v56 }
 0x2b5   :  { %v2015_v62 = vpop.eup %2014  ;;  %2028 = vrsqrt.f32 %v2893_v26 }
 0x2b6   :  { %v2017_v50 = vpop.eup %2016  ;;  %v1239_v43 = vmul.f32 %v2015_v62, %v2800_v10 }
 0x2b7   :  { %v2924_v30 = vpop.xlane.xlu0 %1367  ;;  %v2926_v4 = vpop.xlane.xlu1 %1207  ;;  %v1253_v31 = vmul.f32 %v2017_v50, %v2802_v41  ;;  %v1290_v50 = vsel %vm1289_vm8, %v2786_v1, %v1288_v47  ;;  %vm1435_vm8 = vcmp.eq.f32.partialorder %v2891_v56, inf }
 0x2b8   :  { %v1241_v21 = vsel %vm1240_vm7, %v2800_v10, %v1239_v43  ;;  %2030 = vrsqrt.f32 %v2924_v30  ;;  %v1471_v10 = vsel %vm1470_vm6, %v2784_v37, %v1469_v12  ;;  %vm1312_vm7 = vcmp.eq.f32.partialorder %v2841_v17, 0.0 }
 0x2b9   :  { %v2019_v20 = vpop.eup %2018  ;;  %v1244_v25 = vsel %vm1242_vm9, %v1243_v13, %v1241_v21  ;;  %2032 = vrsqrt.f32 %v2926_v4  ;;  %vm1456_vm9 = vcmp.eq.f32.partialorder %v2859_v38, inf  ;;  %v1662_v43 = vrot.slane %v2946_v58, %v2769_v27 }
 0x2ba   :  { %v2021_v55 = vpop.eup %2020  ;;  %v1399_v13 = vmul.f32 %v2019_v20, %v2839_v29  ;;  %v1527_v24 = vrot.slane %v1244_v25, %v2775_v51  ;;  %v2976_v22 = vsel %vm1472_vm10, %v1473_v53, %v1471_v10  ;;  %v1255_v40 = vsel %vm1254_vm12, %v2802_v41, %v1253_v31 }
 0x2bb   :  { %v2958_v6 = vpop.xlane.xlu0 %1383  ;;  %v2960_v62 = vpop.xlane.xlu1 %1223  ;;  %v1309_v42 = vmul.f32 %v2021_v55, %v2841_v17  ;;  %v1648_v21 = vrot.slane %v1397_v39, %v2766_v2  ;;  %vm1296_vm6 = vcmp.eq.f32.partialorder %v2861_v15, inf  ;;  %v1299_v37 = vand.u32 2147483648, %v2861_v15 }
 0x2bc   :  { %v1401_v34 = vsel %vm1400_vm14, %v2839_v29, %v1399_v13  ;;  %2034 = vrsqrt.f32 %v2958_v6  ;;  %v2992_v53 = vsel %vm1291_vm13, %v1292_v54, %v1290_v50  ;;  %v1438_v2 = vand.u32 2147483648, %v2891_v56 }
 0x2bd   :  { %v2023_v12 = vpop.eup %2022  ;;  %v1404_v20 = vsel %vm1402_vm15, %v1403_v16, %v1401_v34  ;;  %2036 = vrsqrt.f32 %v2960_v62  ;;  %v1529_v31 = vsel %vm1528_vm11, %v1527_v24, %v1522_v57  ;;  %v1258_v1 = vsel %vm1256_vm1, %v1257_v35, %v1255_v40 }
 0x2be   :  { %v2025_v47 = vpop.eup %2024  ;;  %v1455_v54 = vmul.f32 %v2023_v12, %v2859_v38  ;;  %v1652_v10 = vrot.slane %v1404_v20, %v2775_v51  ;;  %v1311_v13 = vsel %vm1310_vm3, %v2841_v17, %v1309_v42  ;;  %vm1275_vm10 = vcmp.eq.f32.partialorder %v2893_v26, inf }
 0x2bf   :  { %v2998_v29 = vpop.xlane.xlu0 %1373  ;;  %v3000_v16 = vpop.xlane.xlu1 %1213  ;;  %v1295_v39 = vmul.f32 %v2025_v47, %v2861_v15  ;;  %v1576_v57 = vrot.slane %v2992_v53, %v2761_v8  ;;  %vm1437_vm12 = vcmp.eq.f32.partialorder %v2891_v56, 0.0  ;;  %v1278_v41 = vand.u32 2147483648, %v2893_v26 }
 0x2c0   :  { %vm1421_vm13 = vcmp.eq.f32.partialorder %v2924_v30, inf  ;;  %v1424_v51 = vand.u32 2147483648, %v2924_v30  ;;  %v1536_v35 = vsel %vm1535_vm2, %v1534_v33, %v1529_v31  ;;  %v1541_v24 = vrot.slane %v1258_v1, %v2769_v27 }
 0x2c1   :  { %v2027_v55 = vpop.eup %2026  ;;  %vm1277_vm14 = vcmp.eq.f32.partialorder %v2893_v26, 0.0  ;;  %vm1423_vm15 = vcmp.eq.f32.partialorder %v2924_v30, 0.0  ;;  %vm1261_vm1 = vcmp.eq.f32.partialorder %v2926_v4, inf  ;;  %2038 = vrsqrt.f32 %v2998_v29 }
 0x2c2   :  { %v2029_v50 = vpop.eup %2028  ;;  %v3037_v40 = vsel %vm1312_vm7, %v1313_v60, %v1311_v13  ;;  %v1457_v7 = vsel %vm1456_vm9, %v2859_v38, %v1455_v54  ;;  %v1434_v33 = vmul.f32 %v2027_v55, %v2891_v56  ;;  %2040 = vrsqrt.f32 %v3000_v16 }
 0x2c3   :  { %v3031_v34 = vpop.xlane.xlu0 %1369  ;;  %v3033_v12 = vpop.xlane.xlu1 %1209  ;;  %v1653_v47 = vsel %vm1528_vm11, %v1652_v10, %v1648_v21  ;;  %v1297_v20 = vsel %vm1296_vm6, %v2861_v15, %v1295_v39  ;;  %v1274_v31 = vmul.f32 %v2029_v50, %v2893_v26  ;;  %vm1263_vm3 = vcmp.eq.f32.partialorder %v2926_v4, 0.0 }
 0x2c4   :  { %v3051_v60 = vsel %vm1542_vm4, %v1541_v24, %v1536_v35  ;;  %v1264_v54 = vand.u32 2147483648, %v2926_v4  ;;  %vm1477_vm7 = vcmp.eq.f32.partialorder %v2958_v6, inf  ;;  %v1597_v21 = vrot.slane %v3037_v40, %v2772_v49 }
 0x2c5   :  { %v2031_v42 = vpop.eup %2030  ;;  %v3062_v55 = vsel %vm1458_vm0, %v1459_v46, %v1457_v7  ;;  %2042 = vrsqrt.f32 %v3031_v34  ;;  %v1658_v50 = vsel %vm1535_vm2, %v1657_v9, %v1653_v47  ;;  %v3076_v35 = vsel %vm1298_vm5, %v1299_v37, %v1297_v20 }
 0x2c6   :  { %v2033_v17 = vpop.eup %2032  ;;  %v1420_v1 = vmul.f32 %v2031_v42, %v2924_v30  ;;  %v1436_v38 = vsel %vm1435_vm8, %v2891_v56, %v1434_v33  ;;  %vm1549_vm11 = vcmask 326912   ;;  %vm1479_vm9 = vcmp.eq.f32.partialorder %v2958_v6, 0.0 }
 0x2c7   :  { %v1260_v10 = vmul.f32 %v2033_v17, %v2926_v4  ;;  %v3066_v13 = vpop.xlane.xlu0 %1387  ;;  %v3068_v39 = vpop.xlane.xlu1 %1227  ;;  %2044 = vrsqrt.f32 %v3033_v12  ;;  %v1276_v45 = vsel %vm1275_vm10, %v2893_v26, %v1274_v31  ;;  %v1480_v15 = vand.u32 2147483648, %v2958_v6 }
 0x2c8   :  { %v1422_v36 = vsel %vm1421_vm13, %v2924_v30, %v1420_v1  ;;  %v1692_v37 = vrot.slane %v3062_v55, %v2778_v52  ;;  %vm1317_vm2 = vcmp.eq.f32.partialorder %v2960_v62, inf  ;;  %v1320_v7 = vand.u32 2147483648, %v2960_v62 }
 0x2c9   :  { %v2035_v46 = vpop.eup %2034  ;;  %v1262_v9 = vsel %vm1261_vm1, %v2926_v4, %v1260_v10  ;;  %v1583_v33 = vrot.slane %v3076_v35, %v2778_v52  ;;  %v3104_v42 = vsel %vm1437_vm12, %v1438_v2, %v1436_v38  ;;  %v1663_v47 = vsel %vm1542_vm4, %v1662_v43, %v1658_v50 }
 0x2ca   :  { %v1476_v24 = vmul.f32 %v2035_v46, %v2958_v6  ;;  %vm1319_vm0 = vcmp.eq.f32.partialorder %v2960_v62, 0.0  ;;  %2046 = vrsqrt.f32 %v3066_v13  ;;  %v2037_v17 = vpop.eup %2036  ;;  %v3118_v1 = vsel %vm1277_vm14, %v1278_v41, %v1276_v45 }
 0x2cb   :  { %v3112_v20 = vpop.xlane.xlu0 %1385  ;;  %v3114_v31 = vpop.xlane.xlu1 %1225  ;;  %v1425_v56 = vsel %vm1423_vm15, %v1424_v51, %v1422_v36  ;;  %v1265_v27 = vsel %vm1263_vm3, %v1264_v54, %v1262_v9  ;;  %2048 = vrsqrt.f32 %v3068_v39  ;;  %v1316_v58 = vmul.f32 %v2037_v17, %v2960_v62 }
 0x2cc   :  { %vm1442_vm4 = vcmp.eq.f32.partialorder %v2998_v29, inf  ;;  %v1445_v43 = vand.u32 2147483648, %v2998_v29  ;;  %vm1282_vm6 = vcmp.eq.f32.partialorder %v3000_v16, inf  ;;  %v1677_v26 = vrot.slane %v3104_v42, %v2805_v61 }
 0x2cd   :  { %v1478_v30 = vsel %vm1477_vm7, %v2958_v6, %v1476_v24  ;;  %v1285_v4 = vand.u32 2147483648, %v3000_v16  ;;  %2050 = vrsqrt.f32 %v3112_v20  ;;  %v1562_v2 = vrot.slane %v3118_v1, %v2805_v61 }
 0x2ce   :  { %v1667_v41 = vrot.slane %v1425_v56, %v2809_v63  ;;  %v1548_v51 = vrot.slane %v1265_v27, %v2809_v63  ;;  %vm1444_vm5 = vcmp.eq.f32.partialorder %v2998_v29, 0.0  ;;  %vm1284_vm8 = vcmp.eq.f32.partialorder %v3000_v16, 0.0  ;;  %v2039_v10 = vpop.eup %2038 }
 0x2cf   :  { %vm1428_vm10 = vcmp.eq.f32.partialorder %v3031_v34, inf  ;;  %v3143_v54 = vpop.xlane.xlu0 %1389  ;;  %vm1556_vm12 = vcmask 392512   ;;  %vm1430_vm13 = vcmp.eq.f32.partialorder %v3031_v34, 0.0  ;;  %v1431_v50 = vand.u32 2147483648, %v3031_v34  ;;  %v3149_v38 = vpop.xlane.xlu1 %1229 }
 0x2d0   :  { %vm1268_vm14 = vcmp.eq.f32.partialorder %v3033_v12, inf  ;;  %2052 = vrsqrt.f32 %v3114_v31  ;;  %v2041_v63 = vpop.eup %2040  ;;  %v3153_v46 = vsel %vm1479_vm9, %v1480_v15, %v1478_v30  ;;  %v1318_v45 = vsel %vm1317_vm2, %v2960_v62, %v1316_v58 }
 0x2d1   :  { %v1441_v36 = vmul.f32 %v2039_v10, %v2998_v29  ;;  %2054 = vrsqrt.f32 %v3143_v54  ;;  %v1281_v9 = vmul.f32 %v2041_v63, %v3000_v16  ;;  %vm1270_vm1 = vcmp.eq.f32.partialorder %v3033_v12, 0.0 }
 0x2d2   :  { %v1271_v24 = vand.u32 2147483648, %v3033_v12  ;;  %vm1491_vm3 = vcmp.eq.f32.partialorder %v3066_v13, inf  ;;  %v1668_v6 = vsel %vm1549_vm11, %v1667_v41, %v1663_v47  ;;  %v1550_v15 = vsel %vm1549_vm11, %v1548_v51, %v3051_v60  ;;  %v2043_v56 = vpop.eup %2042 }
 0x2d3   :  { %v1494_v17 = vand.u32 2147483648, %v3066_v13  ;;  %2056 = vrsqrt.f32 %v3149_v38  ;;  %v3173_v58 = vsel %vm1319_vm0, %v1320_v7, %v1318_v45  ;;  %vm1331_vm2 = vcmp.eq.f32.partialorder %v3068_v39, inf }
 0x2d4   :  { %vm1333_vm7 = vcmp.eq.f32.partialorder %v3068_v39, 0.0  ;;  %v2045_v60 = vpop.eup %2044  ;;  %v1443_v47 = vsel %vm1442_vm4, %v2998_v29, %v1441_v36  ;;  %v1283_v30 = vsel %vm1282_vm6, %v3000_v16, %v1281_v9  ;;  %v1427_v62 = vmul.f32 %v2043_v56, %v3031_v34 }
 0x2d5   :  { %v1334_v7 = vand.u32 2147483648, %v3068_v39  ;;  %v1267_v41 = vmul.f32 %v2045_v60, %v3033_v12  ;;  %vm1484_vm0 = vcmp.eq.f32.partialorder %v3112_v20, inf  ;;  %vm1486_vm15 = vcmp.eq.f32.partialorder %v3112_v20, 0.0 }
 0x2d6   :  { %v1487_v51 = vand.u32 2147483648, %v3112_v20  ;;  %v1604_v10 = vrot.slane %v3173_v58, %v2812_v18  ;;  %v1429_v63 = vsel %vm1428_vm10, %v3031_v34, %v1427_v62  ;;  %vm1324_vm4 = vcmp.eq.f32.partialorder %v3114_v31, inf }
 0x2d7   :  { %v1327_v45 = vand.u32 2147483648, %v3114_v31  ;;  %vm1598_vm6 = vcmask 786112   ;;  %v2047_v36 = vpop.eup %2046  ;;  %v1446_v9 = vsel %vm1444_vm5, %v1445_v43, %v1443_v47  ;;  %v1286_v56 = vsel %vm1284_vm8, %v1285_v4, %v1283_v30 }
 0x2d8   :  { %v1432_v60 = vsel %vm1430_vm13, %v1431_v50, %v1429_v63  ;;  %v1269_v27 = vsel %vm1268_vm14, %v3033_v12, %v1267_v41  ;;  %vm1326_vm10 = vcmp.eq.f32.partialorder %v3114_v31, 0.0  ;;  %vm1498_vm9 = vcmp.eq.f32.partialorder %v3143_v54, inf  ;;  %v2049_v62 = vpop.eup %2048 }
 0x2d9   :  { %v1672_v25 = vrot.slane %v1432_v60, %v2820_v3  ;;  %v1272_v29 = vsel %vm1270_vm1, %v1271_v24, %v1269_v27  ;;  %v1490_v16 = vmul.f32 %v2047_v36, %v3066_v13  ;;  %vm1500_vm5 = vcmp.eq.f32.partialorder %v3143_v54, 0.0 }
 0x2da   :  { %v1501_v34 = vand.u32 2147483648, %v3143_v54  ;;  %v1555_v43 = vrot.slane %v1272_v29, %v2820_v3  ;;  %v1330_v4 = vmul.f32 %v2049_v62, %v3068_v39  ;;  %vm1338_vm13 = vcmp.eq.f32.partialorder %v3149_v38, inf  ;;  %v2051_v47 = vpop.eup %2050 }
 0x2db   :  { %v1341_v50 = vand.u32 2147483648, %v3149_v38  ;;  %v1682_v30 = vrot.slane %v1446_v9, %v2815_v19  ;;  %v1569_v12 = vrot.slane %v1286_v56, %v2815_v19  ;;  %v1673_v24 = vsel %vm1556_vm12, %v1672_v25, %v1668_v6 }
 0x2dc   :  { %v1492_v27 = vsel %vm1491_vm3, %v3066_v13, %v1490_v16  ;;  %vm1340_vm14 = vcmp.eq.f32.partialorder %v3149_v38, 0.0  ;;  %vm1619_vm1 = vcmask 982912   ;;  %vm3332_vm8 = vcmask 458112  }
 0x2dd   :  { %v1678_v3 = vsel %vm3332_vm8, %v1677_v26, %v1673_v24  ;;  %v1557_v41 = vsel %vm1556_vm12, %v1555_v43, %v1550_v15  ;;  %v1332_v19 = vsel %vm1331_vm2, %v3068_v39, %v1330_v4  ;;  %v1483_v25 = vmul.f32 %v2051_v47, %v3112_v20  ;;  %v2053_v6 = vpop.eup %2052  ;;  %vm3333_vm3 = vmmov %vm3332_vm8 }
 0x2de   :  { %vm1626_vm11 = vcmask 1048512   ;;  %v1564_v63 = vsel %vm3333_vm3, %v1562_v2, %v1557_v41  ;;  %v1335_v42 = vsel %vm1333_vm7, %v1334_v7, %v1332_v19  ;;  %vm3334_vm8 = vcmp.eq.f32.partialorder %v3066_v13, 0.0  ;;  %v2055_v36 = vpop.eup %2054 }
 0x2df   :  { %v1495_v26 = vsel %vm3334_vm8, %v1494_v17, %v1492_v27  ;;  %vm3335_vm12 = vcmask 523712   ;;  %v1485_v9 = vsel %vm1484_vm0, %v3112_v20, %v1483_v25  ;;  %v1323_v56 = vmul.f32 %v2053_v6, %v3114_v31 }
 0x2e0   :  { %v1683_v15 = vsel %vm3335_vm12, %v1682_v30, %v1678_v3  ;;  %vm3336_vm2 = vmmov %vm3335_vm12  ;;  %v1618_v61 = vrot.slane %v1335_v42, %v2823_v5  ;;  %v1488_v39 = vsel %vm1486_vm15, %v1487_v51, %v1485_v9  ;;  %v1497_v1 = vmul.f32 %v2055_v36, %v3143_v54  ;;  %v2057_v17 = vpop.eup %2056 }
 0x2e1   :  { %v1571_v60 = vsel %vm3336_vm2, %v1569_v12, %v1564_v63  ;;  %vm3337_vm7 = vcmask 589312   ;;  %v1325_v7 = vsel %vm1324_vm4, %v3114_v31, %v1323_v56  ;;  %vm3339_vm15 = vcmask 654912  }
 0x2e2   :  { %v1578_v13 = vsel %vm3337_vm7, %v1576_v57, %v1571_v60  ;;  %vm3338_vm0 = vmmov %vm3337_vm7  ;;  %v1712_v57 = vrot.slane %v1488_v39, %v2830_v11  ;;  %v1328_v8 = vsel %vm1326_vm10, %v1327_v45, %v1325_v7  ;;  %v1499_v59 = vsel %vm1498_vm9, %v3143_v54, %v1497_v1 }
 0x2e3   :  { %v1688_v2 = vsel %vm3338_vm0, %v1687_v14, %v1683_v15  ;;  %v1585_v20 = vsel %vm3339_vm15, %v1583_v33, %v1578_v13  ;;  %vm3340_vm3 = vmmov %vm3339_vm15  ;;  %v1337_v14 = vmul.f32 %v2057_v17, %v3149_v38  ;;  %vm3341_vm4 = vcmask 720512  }
 0x2e4   :  { %v1693_v53 = vsel %vm3340_vm3, %v1692_v37, %v1688_v2  ;;  %v1592_v35 = vsel %vm3341_vm4, %v1590_v48, %v1585_v20  ;;  %v1502_v52 = vsel %vm1500_vm5, %v1501_v34, %v1499_v59  ;;  %v1611_v37 = vrot.slane %v1328_v8, %v2830_v11  ;;  %vm3342_vm9 = vmmov %vm3341_vm4 }
 0x2e5   :  { %v1599_v55 = vsel %vm1598_vm6, %v1597_v21, %v1592_v35  ;;  %v1698_v33 = vsel %vm3342_vm9, %v1697_v32, %v1693_v53  ;;  %v1339_v23 = vsel %vm1338_vm13, %v3149_v38, %v1337_v14  ;;  %vm3343_vm10 = vcmask 851712  }
 0x2e6   :  { %v1606_v48 = vsel %vm3343_vm10, %v1604_v10, %v1599_v55  ;;  %v3344_v40 = vrot.slane %v2976_v22, %v2772_v49  ;;  %v1717_v11 = vrot.slane %v1495_v26, %v2823_v5  ;;  %v1342_v28 = vsel %vm1340_vm14, %v1341_v50, %v1339_v23  ;;  %vm3347_vm13 = vmmov %vm3343_vm10 }
 0x2e7   :  { %vm3345_vm5 = vcmask 917312   ;;  %v3346_v32 = vrot.slane %v3153_v46, %v2812_v18  ;;  %v1722_v54 = vrot.slane %v1502_v52, %v2833_v0  ;;  %v1625_v49 = vrot.slane %v1342_v28, %v2833_v0 }
 0x2e8   :  { %v1703_v21 = vsel %vm1598_vm6, %v3344_v40, %v1698_v33  ;;  %v1613_v44 = vsel %vm3345_vm5, %v1611_v37, %v1606_v48  ;;  %vm3348_vm8 = vmmov %vm3345_vm5  ;;  %vm1725_vm6 = vcmask 1040384  }
 0x2e9   :  { %v1708_v31 = vsel %vm3347_vm13, %v3346_v32, %v1703_v21  ;;  %v1620_v5 = vsel %vm1619_vm1, %v1618_v61, %v1613_v44 }
 0x2ea   :  { %v1713_v22 = vsel %vm3348_vm8, %v1712_v57, %v1708_v31  ;;  %v1627_v58 = vsel %vm1626_vm11, %v1625_v49, %v1620_v5 }
 0x2eb   :  { %v1718_v38 = vsel %vm1619_vm1, %v1717_v11, %v1713_v22 }
 0x2ec   :  { %v1723_v51 = vsel %vm1626_vm11, %v1722_v54, %v1718_v38 }
 0x2ed   :  { %v1726_v18 = vsel %vm1725_vm6, %v1627_v58, %v1723_v51 }
 0x2ee   :  { %1727 = vst [vmem:[#allocation4] sm:$0x3] %v1726_v18 }
 0x2ef   :  { %2069 = shalt.err (!%p2066_p5)
}
 0x2f0   :  { %1737 = dma.vmem_to_hbm [thread:$0]  %s1735_s4, 32, %s3329_s7, [#allocation5]  }
 0x2f1   :  { %2078 = dma.done.wait [#allocation5], 32  }
 0x2f2   :  { %2079 = vsyncadd [#allocation5], 4294967264 }
 0x2f3   :  { %1741 = vsyncpa [#allocation5], 1 }

</bundles_post_ra>
